<compile_context>
chip_gen: v6e
topology: v6e:2x2x1
jax: 0.10.0
libtpu: 0.0.40
codegen_flags: <defaults>
</compile_context>

<pallas_src>
import functools
import math

import jax
import jax.numpy as jnp
from jax.experimental import pallas as pl
from jax.experimental.pallas import tpu as pltpu

EPS = 1e-5  # nn.BatchNorm3d default


def _ceil_to(v, m):
    return ((v + m - 1) // m) * m


def _pick_row_tile(m, cap=256):
    """Return (tile, padded_m) with tile a multiple of 8 dividing padded_m."""
    mp8 = _ceil_to(max(m, 1), 8)
    if mp8 <= cap:
        return mp8, mp8
    return cap, _ceil_to(m, cap)


def _divisor_tile(mp, cap):
    """Largest multiple-of-8 divisor of mp that is <= cap, preferring >= 2
    blocks (v7x dual TensorCore); falls back to the full dim."""
    hi = min(cap, mp)
    if mp >= 16:
        hi = min(hi, mp // 2)
    hi = (hi // 8) * 8
    for cand in range(hi, 7, -8):
        if mp % cand == 0:
            return cand
    return mp


# --------------------------------------------------------------------------
# Pallas kernels
# --------------------------------------------------------------------------

def _conv_bn_stats_kernel(a_ref, b_ref, o_ref, sum_ref, ssq_ref):
    """Tiled matmul (bf16 in, f32 out) accumulating directly into the resident
    output block; per-channel sum / sum-of-squares fused into the K finalize."""
    kq = pl.program_id(2)
    part = jnp.dot(a_ref[...], b_ref[...], preferred_element_type=jnp.float32)

    @pl.when(kq == 0)
    def _():
        o_ref[...] = part

    @pl.when(kq > 0)
    def _():
        o_ref[...] += part

    @pl.when(kq == pl.num_programs(2) - 1)
    def _():
        acc = o_ref[...]
        s = jnp.sum(acc, axis=0, keepdims=True)
        ss = jnp.sum(acc * acc, axis=0, keepdims=True)
        # 8-sublane blocks; row 0 of each block carries the partial (rest is a
        # broadcast copy that the wrapper ignores).
        sum_ref[...] = jnp.broadcast_to(s, sum_ref.shape)
        ssq_ref[...] = jnp.broadcast_to(ss, ssq_ref.shape)


def _bn_apply_kernel(x_ref, sc_ref, sh_ref, o_ref, *, relu):
    y = x_ref[...] * sc_ref[...] + sh_ref[...]            # f32 math
    if relu:
        y = jnp.maximum(y, 0.0)
    o_ref[...] = y.astype(o_ref.dtype)                    # bf16 store


def _bn_apply_res_kernel(x_ref, res_ref, sc_ref, sh_ref, o_ref, *, relu):
    y = (x_ref[...] * sc_ref[...] + sh_ref[...]
         + res_ref[...].astype(jnp.float32))
    if relu:
        y = jnp.maximum(y, 0.0)
    o_ref[...] = y.astype(o_ref.dtype)


def _pool3_kernel(x_ref, o_ref):
    """1-D max pool (kernel 3, stride 2, pad 1) along axis 1 of a 4-D block.
    Taps are formed in-kernel by an even/odd regrouping of the leading axis."""
    x = x_ref[...]
    lo = o_ref.shape[1]
    l_in = x.shape[1]
    if l_in < 2 * lo:                                      # odd length: right-pad
        pad = jnp.full((x.shape[0], 2 * lo - l_in) + tuple(x.shape[2:]),
                       -jnp.inf, x.dtype)
        x = jnp.concatenate([x, pad], axis=1)
    xr = x.reshape(x.shape[0], lo, 2, x.shape[2], x.shape[3])
    ev, od = xr[:, :, 0], xr[:, :, 1]
    p = jnp.maximum(ev, od)                                # max(x[2i], x[2i+1])
    if lo == 1:
        o_ref[...] = p
    else:
        # out[i] = max(x[2i-1], x[2i], x[2i+1]); x[-1] is the implicit -inf pad
        o_ref[:, 0:1] = p[:, 0:1]
        o_ref[:, 1:] = jnp.maximum(p[:, 1:], od[:, :lo - 1])


# --------------------------------------------------------------------------
# Conv3d (im2col + tiled Pallas matmul with fused BN statistics)
# --------------------------------------------------------------------------

def _im2col(x, ksize, stride, padding):
    """x: (N,D,H,W,C) -> patches (N,Do,Ho,Wo,k^3,C), taps in (kd,kh,kw) order."""
    n, d, h, w, c = x.shape
    s, p, k = stride, padding, ksize
    do = (d + 2 * p - k) // s + 1
    ho = (h + 2 * p - k) // s + 1
    wo = (w + 2 * p - k) // s + 1
    xp = jnp.pad(x, ((0, 0), (p, p), (p, p), (p, p), (0, 0))) if p else x
    taps = []
    for a in range(k):
        for b_ in range(k):
            for cc in range(k):
                taps.append(xp[:, a:a + (do - 1) * s + 1:s,
                               b_:b_ + (ho - 1) * s + 1:s,
                               cc:cc + (wo - 1) * s + 1:s, :])
    pat = jnp.stack(taps, axis=4)
    return pat, (n, do, ho, wo)


def conv3d_bn(x5d, w, stride, padding):
    """x5d: (N,D,H,W,Cin) channels-last; w: (Cout,Cin,k,k,k) (PyTorch layout).

    One Pallas matmul over im2col patches with fused BN batch statistics.
    Returns (y2d_padded (M_pad, Cout) f32, mean, var, M, out5_shape)."""
    cout, cin, k, _, _ = w.shape
    pat, (n_, do, ho, wo) = _im2col(x5d.astype(jnp.bfloat16), k, stride, padding)
    m = n_ * do * ho * wo
    kk = k * k * k * cin
    a = pat.reshape(m, kk)
    b = jnp.transpose(w, (2, 3, 4, 1, 0)).reshape(kk, cout).astype(jnp.bfloat16)

    # --- tile selection -----------------------------------------------------
    tm, mp = _pick_row_tile(m, 256)
    tn = cout if cout <= 256 else 256
    if (mp // tm) * (cout // tn) < 2:       # >= 2 parallel blocks when possible
        if cout >= 256:
            tn = 128
        elif tm % 16 == 0:
            tm //= 2
    gm, gn = mp // tm, cout // tn

    TK_CAP = 4096                            # few large K steps (gk in {1,2,4})
    kp = _ceil_to(kk, 128)
    if kp <= TK_CAP:
        tk, gk = kp, 1
    else:
        gk = -(-kp // TK_CAP)
        tk = _ceil_to(-(-kp // gk), 128)
        kp = tk * gk

    ap = jnp.pad(a, ((0, mp - m), (0, kp - kk)))
    bp = jnp.pad(b, ((0, kp - kk), (0, 0)))

    y, s_out, ss_out = pl.pallas_call(
        _conv_bn_stats_kernel,
        out_shape=(jax.ShapeDtypeStruct((mp, cout), jnp.float32),
                   jax.ShapeDtypeStruct((8 * gm, cout), jnp.float32),
                   jax.ShapeDtypeStruct((8 * gm, cout), jnp.float32)),
        grid=(gm, gn, gk),
        in_specs=[pl.BlockSpec((tm, tk), lambda i, j, kq: (i, kq)),
                  pl.BlockSpec((tk, tn), lambda i, j, kq: (kq, j))],
        out_specs=(pl.BlockSpec((tm, tn), lambda i, j, kq: (i, j)),
                   pl.BlockSpec((8, tn), lambda i, j, kq: (i, j)),
                   pl.BlockSpec((8, tn), lambda i, j, kq: (i, j))),
        compiler_params=pltpu.CompilerParams(
            dimension_semantics=("parallel", "parallel", "arbitrary"),
            vmem_limit_bytes=48 * 1024 * 1024),
    )(ap, bp)

    # Row 0 of each 8-row stats block holds that block's partial; padded im2col
    # rows are exact zeros so they contribute nothing to the sums.
    s_rows = s_out.reshape(gm, 8, cout)[:, 0, :]
    ss_rows = ss_out.reshape(gm, 8, cout)[:, 0, :]
    cnt = jnp.float32(m)
    mean = jnp.sum(s_rows, axis=0) / cnt
    var = jnp.maximum(jnp.sum(ss_rows, axis=0) / cnt - mean * mean, 0.0)
    return y, mean, var, m, (n_, do, ho, wo, cout)


# --------------------------------------------------------------------------
# BatchNorm apply (+ residual + ReLU), row-tiled, bf16 stores
# --------------------------------------------------------------------------

def batchnorm_apply(x2d, mean, var, gamma, beta, relu=False, residual=None):
    """Train-mode BN (batch mean/var) fused with optional residual add + ReLU.
    x2d: (M_pad, C) f32; residual (if any): (M_pad, C) bf16.  Math in f32,
    stored in bf16; C == 64 activations are reinterpreted as 128-lane rows."""
    mp, c = x2d.shape
    inv = 1.0 / jnp.sqrt(var + EPS)
    scale = (gamma * inv).astype(jnp.float32)
    shift = (beta - mean * gamma * inv).astype(jnp.float32)

    fold = (c == 64 and mp % 2 == 0)
    if fold:
        x2d = x2d.reshape(mp // 2, 128)
        if residual is not None:
            residual = residual.reshape(mp // 2, 128)
        scale = jnp.concatenate([scale, scale])
        shift = jnp.concatenate([shift, shift])
    mpf, cf = x2d.shape
    scale = scale.reshape(1, cf)
    shift = shift.reshape(1, cf)

    tile = _divisor_tile(mpf, 512)
    row_spec = pl.BlockSpec((tile, cf), lambda i: (i, 0))
    vec_spec = pl.BlockSpec((1, cf), lambda i: (0, 0))

    if residual is None:
        kern = functools.partial(_bn_apply_kernel, relu=relu)
        in_specs = [row_spec, vec_spec, vec_spec]
        args = (x2d, scale, shift)
    else:
        kern = functools.partial(_bn_apply_res_kernel, relu=relu)
        in_specs = [row_spec, row_spec, vec_spec, vec_spec]
        args = (x2d, residual, scale, shift)

    y = pl.pallas_call(
        kern,
        out_shape=jax.ShapeDtypeStruct((mpf, cf), jnp.bfloat16),
        grid=(mpf // tile,),
        in_specs=in_specs,
        out_specs=row_spec,
        compiler_params=pltpu.CompilerParams(dimension_semantics=("parallel",)),
    )(*args)
    if fold:
        y = y.reshape(mp, c)
    return y


# --------------------------------------------------------------------------
# MaxPool3d(kernel=3, stride=2, padding=1): three separable in-kernel 1-D pools
# --------------------------------------------------------------------------

def _pool_axis(x, axis):
    shp = x.shape
    l_in = shp[axis]
    lo = (l_in + 2 - 3) // 2 + 1
    a_dim = int(math.prod(shp[:axis]))
    b_dim = int(math.prod(shp[axis + 1:-1]))
    c_dim = shp[-1]
    # Fold C==64 into 128 lanes when possible (lane-dense stores).
    if c_dim == 64 and b_dim % 2 == 0 and b_dim >= 2:
        b2, c2 = b_dim // 2, 128
    else:
        b2, c2 = b_dim, c_dim
    x4 = x.reshape(a_dim, l_in, b2, c2)

    tb = _divisor_tile(b2, 256)
    out = pl.pallas_call(
        _pool3_kernel,
        out_shape=jax.ShapeDtypeStruct((a_dim, lo, b2, c2), x.dtype),
        grid=(a_dim, b2 // tb),
        in_specs=[pl.BlockSpec((1, l_in, tb, c2), lambda a, b: (a, 0, b, 0))],
        out_specs=pl.BlockSpec((1, lo, tb, c2), lambda a, b: (a, 0, b, 0)),
        compiler_params=pltpu.CompilerParams(
            dimension_semantics=("parallel", "parallel")),
    )(x4)
    return out.reshape(shp[:axis] + (lo,) + shp[axis + 1:])


def maxpool3d(x):
    for ax in (1, 2, 3):   # D, H, W
        x = _pool_axis(x, ax)
    return x


# --------------------------------------------------------------------------
# ResNet-18 encoder
# --------------------------------------------------------------------------

ARCH = (("layer1", 64, 1), ("layer2", 128, 2),
        ("layer3", 256, 2), ("layer4", 512, 2))


def init_params(key):
    keys = iter(jax.random.split(key, 64))

    def kaiming(k, cout, cin, ks):
        fan_out = cout * ks ** 3  # kaiming_normal_(mode='fan_out', relu)
        std = math.sqrt(2.0 / fan_out)
        return jax.random.normal(k, (cout, cin, ks, ks, ks),
                                 dtype=jnp.float32) * std

    params = {"conv1": kaiming(next(keys), 64, 2, 7),
              "bn1_g": jnp.ones((64,), jnp.float32),
              "bn1_b": jnp.zeros((64,), jnp.float32)}
    inplanes = 64
    for name, planes, stride in ARCH:
        blocks = []
        for b in range(2):  # BasicBlock x2 per layer (ResNet-18)
            s = stride if b == 0 else 1
            blk = {"w1": kaiming(next(keys), planes, inplanes, 3),
                   "g1": jnp.ones((planes,), jnp.float32),
                   "b1": jnp.zeros((planes,), jnp.float32),
                   "w2": kaiming(next(keys), planes, planes, 3),
                   "g2": jnp.ones((planes,), jnp.float32),
                   "b2": jnp.zeros((planes,), jnp.float32)}
            if s != 1 or inplanes != planes:
                blk["ds_w"] = kaiming(next(keys), planes, inplanes, 1)
                blk["ds_g"] = jnp.ones((planes,), jnp.float32)
                blk["ds_b"] = jnp.zeros((planes,), jnp.float32)
            blocks.append(blk)
            inplanes = planes
        params[name] = blocks
    return params


def basic_block(x5d, blk, stride):
    n, d, h, w, cin = x5d.shape

    # conv1 -> bn1 -> relu
    y2d, mean, var, m, shp = conv3d_bn(x5d, blk["w1"], stride, 1)
    y2d = batchnorm_apply(y2d, mean, var, blk["g1"], blk["b1"], relu=True)
    y5 = y2d[:m].reshape(shp)

    # conv2 (pre-BN output kept in padded-row layout)
    z2d, mean2, var2, m2, shp2 = conv3d_bn(y5, blk["w2"], 1, 1)
    mp2 = z2d.shape[0]

    # identity path (bf16)
    if "ds_w" in blk:
        i2d, dmean, dvar, _dm, _ = conv3d_bn(x5d, blk["ds_w"], stride, 0)
        identity = batchnorm_apply(i2d, dmean, dvar, blk["ds_g"], blk["ds_b"],
                                   relu=False)                  # (mp2, planes)
    else:
        identity = x5d.reshape(n * d * h * w, cin)
        if identity.shape[0] < mp2:
            identity = jnp.pad(identity, ((0, mp2 - identity.shape[0]), (0, 0)))

    # bn2 + residual add + relu (fused)
    out2d = batchnorm_apply(z2d, mean2, var2, blk["g2"], blk["b2"],
                            relu=True, residual=identity)
    return out2d[:m2].reshape(shp2)


def resnet_encoder_forward(params, src_img, trt_img):
    """src_img, trt_img: (N, 1, D, H, W) NCDHW (PyTorch convention).
    Returns the 5 feature maps in NCDHW (f32), matching the PyTorch module."""
    x = jnp.concatenate([src_img, trt_img], axis=1)             # (N, 2, D, H, W)
    x = jnp.transpose(x, (0, 2, 3, 4, 1)).astype(jnp.float32)   # -> NDHWC

    y2d, mean, var, m, shp = conv3d_bn(x, params["conv1"], 2, 3)
    f0_2d = batchnorm_apply(y2d, mean, var, params["bn1_g"], params["bn1_b"],
                            relu=True)
    f0 = f0_2d[:m].reshape(shp)
    features = [f0]

    x = maxpool3d(f0)
    for name, _planes, stride in ARCH:
        for b, blk in enumerate(params[name]):
            s = stride if b == 0 else 1
            x = basic_block(x, blk, s)
        features.append(x)

    return [jnp.transpose(ff, (0, 4, 1, 2, 3)).astype(jnp.float32)
            for ff in features]  # NCDHW


if __name__ == "__main__":
    key = jax.random.PRNGKey(0)
    kp_, ks_, kt_ = jax.random.split(key, 3)
    params = init_params(kp_)

    N, D, H, W = 2, 16, 16, 16
    src = jax.random.normal(ks_, (N, 1, D, H, W), dtype=jnp.float32)
    trt = jax.random.normal(kt_, (N, 1, D, H, W), dtype=jnp.float32)

    feats = resnet_encoder_forward(params, src, trt)
    feats = jax.block_until_ready(feats)

    expected = [(N, 64, 8, 8, 8), (N, 64, 4, 4, 4), (N, 128, 2, 2, 2),
                (N, 256, 1, 1, 1), (N, 512, 1, 1, 1)]
    for f, e in zip(feats, expected):
        assert tuple(f.shape) == e, (tuple(f.shape), e)
        assert bool(jnp.all(jnp.isfinite(f)))
    print("KERNEL_OK")
</pallas_src>

<mosaic_0001>
module attributes {stable_mosaic.version = 11 : i64} {
  func.func @_conv_bn_stats_kernel(%arg0: i32, %arg1: i32, %arg2: i32, %arg3: memref<256x768xbf16, #tpu.memory_space<vmem>>, %arg4: memref<768x64xbf16, #tpu.memory_space<vmem>>, %arg5: memref<256x64xf32, #tpu.memory_space<vmem>>, %arg6: memref<8x64xf32, #tpu.memory_space<vmem>>, %arg7: memref<8x64xf32, #tpu.memory_space<vmem>>) attributes {dimension_semantics = [#tpu.dimension_semantics<parallel>, #tpu.dimension_semantics<parallel>, #tpu.dimension_semantics<arbitrary>], iteration_bounds = array<i64: 4, 1, 1>, scalar_prefetch = 0 : i64, scratch_operands = 0 : i64, tpu.core_type = #tpu.core_type<tc>, window_params = [{transform_indices = @transform_0, window_bounds = array<i64: 256, 768>}, {transform_indices = @transform_1, window_bounds = array<i64: 768, 64>}, {transform_indices = @transform_2, window_bounds = array<i64: 256, 64>}, {transform_indices = @transform_3, window_bounds = array<i64: 8, 64>}, {transform_indices = @transform_4, window_bounds = array<i64: 8, 64>}]} {
    %c0 = arith.constant 0 : index
    %c0_0 = arith.constant 0 : index
    %0 = vector.load %arg3[%c0, %c0_0] : memref<256x768xbf16, #tpu.memory_space<vmem>>, vector<256x768xbf16>
    %c0_1 = arith.constant 0 : index
    %c0_2 = arith.constant 0 : index
    %1 = vector.load %arg4[%c0_1, %c0_2] : memref<768x64xbf16, #tpu.memory_space<vmem>>, vector<768x64xbf16>
    %cst = arith.constant dense<0.000000e+00> : vector<256x64xf32>
    %2 = tpu.matmul %0, %1, %cst {dimension_numbers = #tpu.dot_dimension_numbers<[1], [0], [0], [1], [0, 0, 1, 1], [], []>} : vector<256x768xbf16>, vector<768x64xbf16>, vector<256x64xf32> -> vector<256x64xf32>
    %c0_i32 = arith.constant 0 : i32
    %3 = arith.cmpi eq, %arg2, %c0_i32 : i32
    %4 = arith.extui %3 : i1 to i32
    %c0_i32_3 = arith.constant 0 : i32
    %5 = arith.cmpi ne, %4, %c0_i32_3 : i32
    scf.if %5 {
      %c0_8 = arith.constant 0 : index
      %c0_9 = arith.constant 0 : index
      %12 = vector.load %arg5[%c0_8, %c0_9] : memref<256x64xf32, #tpu.memory_space<vmem>>, vector<256x64xf32>
      tpu.vector_store %arg5[%c0_8, %c0_9], %2 {strides = array<i32>} : memref<256x64xf32, #tpu.memory_space<vmem>>, vector<256x64xf32>,
    } else {
    }
    %c0_i32_4 = arith.constant 0 : i32
    %6 = arith.cmpi sgt, %arg2, %c0_i32_4 : i32
    %7 = arith.extui %6 : i1 to i32
    %c0_i32_5 = arith.constant 0 : i32
    %8 = arith.cmpi ne, %7, %c0_i32_5 : i32
    scf.if %8 {
      %c0_8 = arith.constant 0 : index
      %c0_9 = arith.constant 0 : index
      %12 = vector.load %arg5[%c0_8, %c0_9] : memref<256x64xf32, #tpu.memory_space<vmem>>, vector<256x64xf32>
      %13 = arith.addf %12, %2 : vector<256x64xf32>
      %c0_10 = arith.constant 0 : index
      %c0_11 = arith.constant 0 : index
      %14 = vector.load %arg5[%c0_10, %c0_11] : memref<256x64xf32, #tpu.memory_space<vmem>>, vector<256x64xf32>
      tpu.vector_store %arg5[%c0_10, %c0_11], %13 {strides = array<i32>} : memref<256x64xf32, #tpu.memory_space<vmem>>, vector<256x64xf32>,
    } else {
    }
    %c0_i32_6 = arith.constant 0 : i32
    %9 = arith.cmpi eq, %arg2, %c0_i32_6 : i32
    %10 = arith.extui %9 : i1 to i32
    %c0_i32_7 = arith.constant 0 : i32
    %11 = arith.cmpi ne, %10, %c0_i32_7 : i32
    scf.if %11 {
      %c0_8 = arith.constant 0 : index
      %c0_9 = arith.constant 0 : index
      %12 = vector.load %arg5[%c0_8, %c0_9] : memref<256x64xf32, #tpu.memory_space<vmem>>, vector<256x64xf32>
      %cst_10 = arith.constant dense<0.000000e+00> : vector<64xf32>
      %13 = vector.multi_reduction <add>, %12, %cst_10 [0] : vector<256x64xf32> to vector<64xf32>
      %14 = vector.shape_cast %13 : vector<64xf32> to vector<1x64xf32>
      %15 = arith.mulf %12, %12 : vector<256x64xf32>
      %cst_11 = arith.constant dense<0.000000e+00> : vector<64xf32>
      %16 = vector.multi_reduction <add>, %15, %cst_11 [0] : vector<256x64xf32> to vector<64xf32>
      %17 = vector.shape_cast %16 : vector<64xf32> to vector<1x64xf32>
      %18 = vector.shape_cast %14 : vector<1x64xf32> to vector<1x64xf32>
      %19 = vector.broadcast %18 : vector<1x64xf32> to vector<8x64xf32>
      %c0_12 = arith.constant 0 : index
      %c0_13 = arith.constant 0 : index
      %20 = vector.load %arg6[%c0_12, %c0_13] : memref<8x64xf32, #tpu.memory_space<vmem>>, vector<8x64xf32>
      tpu.vector_store %arg6[%c0_12, %c0_13], %19 {strides = array<i32>} : memref<8x64xf32, #tpu.memory_space<vmem>>, vector<8x64xf32>,
      %21 = vector.shape_cast %17 : vector<1x64xf32> to vector<1x64xf32>
      %22 = vector.broadcast %21 : vector<1x64xf32> to vector<8x64xf32>
      %c0_14 = arith.constant 0 : index
      %c0_15 = arith.constant 0 : index
      %23 = vector.load %arg7[%c0_14, %c0_15] : memref<8x64xf32, #tpu.memory_space<vmem>>, vector<8x64xf32>
      tpu.vector_store %arg7[%c0_14, %c0_15], %22 {strides = array<i32>} : memref<8x64xf32, #tpu.memory_space<vmem>>, vector<8x64xf32>,
    } else {
    }
    return
  }
  func.func @transform_0(%arg0: i32, %arg1: i32, %arg2: i32) -> (i32, i32) {
    %c0_i32 = arith.constant 0 : i32
    return %arg0, %arg2 : i32, i32
  }
  func.func @transform_1(%arg0: i32, %arg1: i32, %arg2: i32) -> (i32, i32) {
    %c0_i32 = arith.constant 0 : i32
    return %arg2, %arg1 : i32, i32
  }
  func.func @transform_2(%arg0: i32, %arg1: i32, %arg2: i32) -> (i32, i32) {
    %c0_i32 = arith.constant 0 : i32
    return %arg0, %arg1 : i32, i32
  }
  func.func @transform_3(%arg0: i32, %arg1: i32, %arg2: i32) -> (i32, i32) {
    %c0_i32 = arith.constant 0 : i32
    return %arg0, %arg1 : i32, i32
  }
  func.func @transform_4(%arg0: i32, %arg1: i32, %arg2: i32) -> (i32, i32) {
    %c0_i32 = arith.constant 0 : i32
    return %arg0, %arg1 : i32, i32
  }
}

</mosaic_0001>

<bundles_post_ra>
// kernel: tpu_custom_call.1
= control target key start
LH: loop header
LB: loop body
LE: loop exit
PB: predicated region body
PF: predicated region fallthrough
CT: control target
= control target key end

     0   :  { %10 = vsyncpa [#allocation3], 0  ;;  %s3993_s0 = inlined_call_operand.hbm [shape: bf16[1024,768], index: 0, kind: input, shape index: {}]   ;;  %s3994_s1 = inlined_call_operand.vmem [shape: bf16[768,64], index: 1, kind: input, shape index: {}]   ;;  %s3995_s2 = inlined_call_operand.vmem [shape: f32[1024,64], index: 2, kind: output, shape index: {0}]   ;;  %s3996_s3 = inlined_call_operand.hbm [shape: f32[32,64], index: 3, kind: output, shape index: {1}]   ;;  %s3997_s4 = inlined_call_operand.hbm [shape: f32[32,64], index: 4, kind: output, shape index: {2}]  }
   0x1   :  { %12 = vsyncpa [#allocation3 + $0x1], 0 }
   0x2   :  { %13 = vsyncpa [#allocation4], 0 }
   0x3   :  { %15 = vsyncpa [#allocation4 + $0x1], 0 }
   0x4   :  { %16 = vsyncpa [#allocation7], 0 }
   0x5   :  { %18 = vsyncpa [#allocation7 + $0x1], 0  ;;  %s3264_s15 = smov 0   ;;  %s3266_s16 = smov 0  }
   0x6   :  { %s3268_s17 = smov 0   ;;  %s3270_s18 = smov 0  }
   0x7   :  { %s3272_s19 = smov 0   ;;  %s3274_s20 = smov 0  }
   0x8 LB: > { %s2315_s21 = sadd.s32 4294967295, %s3232_s20   ;;  %s2316_s22 = sadd.s32 4294967294, %s3232_s20   ;;  %s3232_s20 = sphi %s3274_s20, %s24_s20   ;;  %s3228_s19 = sphi %s3272_s19, %s4011_s19   ;;  %s3224_s18 = sphi %s3270_s18, %s4010_s18   ;;  %s3220_s17 = sphi %s3268_s17, %s4009_s17   ;;  %s3216_s16 = sphi %s3266_s16, %s4008_s16   ;;  %s3212_s15 = sphi %s3264_s15, %s4007_s15  }
   0x9   : > { %s43_s23 = sadd.s32 1, %s3228_s19  ;;  %s52_s24 = sadd.s32 1, %s3220_s17 }
   0xa   : > { %p45_p0 = scmp.ge.s32.totalorder %s43_s23, 4  ;;  %p59_p1 = scmp.ne.s32.totalorder %s3220_s17, %s3216_s16 }
   0xb   : > { %p60_p2 = scmp.eq.s32.totalorder %s3232_s20, 0  ;;  %p65_p3 = scmp.ne.s32.totalorder %s3216_s16, %s3212_s15 }
   0xc   : > { %s4013_s23 = smov (%p45_p0, %s43_s23), 0  ;;  %p66_p5 = scmp.eq.s32.totalorder %s2315_s21, 0 }
   0xd   : > { %p3305_p4 = por %p60_p2, %p59_p1  ;;  %s47_s26 = ssub.s32 %s3228_s19, %s4013_s23 }
   0xe   : > { %p147_p6 = scmp.eq.s32.totalorder %s2315_s21, 3  ;;  %p50_p7 = scmp.eq.s32.totalorder %s47_s26, 0 }
   0xf   : > { %p3311_p8 = por %p66_p5, %p65_p3  ;;  %p153_p10 = scmp.eq.s32.totalorder %s2316_s22, 3 }
  0x10   : > { %p3315_p9 = por %p147_p6, %p59_p1  ;;  %p2850_p12 = scmp.lt.s32.totalorder %s3232_s20, 4 }
  0x11   : > { %s3320_s29 = scalar_select %p50_p7, %s3220_s17, %s52_s24  }
  0x12   : > { %p3322_p11 = por %p153_p10, %p65_p3  ;;  %s213_s5 = sand.u32 1, %s3220_s17  }
  0x13   : > { %s2830_s6 = smul.u32 768, %s213_s5  ;;  %p3331_p13 = pnand %p2850_p12, %p3305_p4 }
  0x14   : > { %s2831_s7 = smul.u32 12288, %s3228_s19  ;;  %p2323_p0 = scmp.ge.s32.totalorder %s3232_s20, 1 }
  0x15   : > { %s217_s12 = scalar_lea.vmem [#allocation2], %s2830_s6  ;;  %s214_s14 = scalar_lea.sflag [#allocation3], %s213_s5 }
  0x16   : > { %s226_s11 = scalar_lea.hbm %s3993_s0, %s2831_s7  ;;  %s227_s13 = sshll.u32 %s217_s12, 4  ;;  %s228_s13 = int_to_ptr.vmem [resolvable:$true] %s227_s13 }
  0x17   : > { %p3096_p1 = pneg %p3331_p13  ;;  %s3107_s21 = scalar_lea.vmem %s228_s13, 12288 }
  0x18   : > { %p3108_p2 = scmp.ne.s32.totalorder %s228_s13, %s3107_s21  ;;  %s3234_s22 = smov [#allocation2]  }
  0x19   : > { %s3112_s24 = sshll.u32 %s3234_s22, 4  ;;  %s3113_s24 = int_to_ptr.vmem [resolvable:$false] %s3112_s24 }
  0x1a   : > { %p3110_p3 = pnand %p3108_p2, %p3096_p1  ;;  %s3114_s25 = scalar_lea.vmem %s3113_s24, 24576 }
  0x1b   : > { %p3115_p4 = scmp.lt.s32.totalorder %s228_s13, %s3113_s24  ;;  %p3116_p6 = scmp.lt.s32.totalorder %s3114_s25, %s3107_s21 }
  0x1c   : > { %p3111_p5 = pneg %p3110_p3 }
  0x1d   : > { %p3117_p7 = por %p3116_p6, %p3115_p4 }
  0x1f   : > { %p3118_p10 = pnand %p3117_p7, %p3111_p5 }
  0x21   : > { %3121 = shalt.err (!%p3118_p10)
}
  0x22   : > { %s3235_s26 = smov 384   ;;  %s3236_s5 = smov 24  }
  0x23   : > { %2842 = dma.hbm_to_vmem [thread:$0]  (!%p3331_p13), %s226_s11, 12288, %s228_s13, %s214_s14, %s3235_s26, %s3235_s26, %s3236_s5  }
  0x24   : > { %p235_p12 = scmp.lt.s32.totalorder %s3232_s20, 5 }
  0x26   : > { %p236_p1 = pnand %p2323_p0, %p235_p12 }
  0x28   : > { %239 = sbr.rel (%p236_p1) target bundleno = 530 (0x212), region = 28 }
  0x2d   : > { %s3347_s6 = sand.u32 1, %s3216_s16  }
  0x2e   : > { %s2832_s7 = smul.u32 768, %s3347_s6  ;;  %s242_s9 = scalar_lea.sflag [#allocation3], %s3347_s6 }
  0x30   : > { %s3351_s10 = scalar_lea.vmem [#allocation2], %s2832_s7 }
  0x31   : > { %3199 = dma.done.wait (%p3311_p8), %s242_s9, 12288  }
  0x32   : > { %3201 = vsyncadd (%p3311_p8), %s242_s9, 4294955008  ;;  %v2902_v0 = vld [vmem:[%s3994_s1 + $0x78] sm:$0xff]   ;;  %v2904_v2 = vld [vmem:[%s3994_s1 + $0x70] sm:$0xff]   ;;  %vm1759_vm0 = vcmask 523264   ;;  %s2324_s12 = sshll.u32 %s3347_s6, 3  ;;  %s2474_s13 = sshll.u32 %s3224_s18, 7 }
  0x33   : > { %v2903_v1 = vld [vmem:[%s3994_s1 + $0x38] sm:$0xff]   ;;  %2478 = vmatprep.subr.bf16.mxu0 %v2902_v0  ;;  %2814 = vmatprep.subr.bf16.mxu1 %v2902_v0  ;;  %v2905_v3 = vld [vmem:[%s3994_s1 + $0x30] sm:$0xff]   ;;  %v2906_v4 = vld [vmem:[%s3994_s1 + $0x68] sm:$0xff]   ;;  %s283_s14 = scalar_lea.vmem [#allocation5], %s2324_s12  ;;  %s3909_s22 = scalar_lea.vmem [#allocation6], %s2324_s12 }
  0x34   : > { %2479 = vmatpush3.bf16.msra.mxu0 %v2903_v1  ;;  %2822 = vmatpush3.bf16.msra.mxu1 %v2903_v1  ;;  %v2907_v5 = vld [vmem:[%s3994_s1 + $0x28] sm:$0xff]   ;;  %v2908_v6 = vld [vmem:[%s3994_s1 + $0x60] sm:$0xff]   ;;  %v2910_v8 = vld [vmem:[%s3994_s1 + $0x58] sm:$0xff]   ;;  %s2133_s21 = sshll.u32 %s283_s14, 4  ;;  %s2147_s24 = sshll.u32 %s3909_s22, 4  ;;  %s3917_s21 = int_to_ptr.vmem [resolvable:$true] %s2133_s21  ;;  %s3925_s24 = int_to_ptr.vmem [resolvable:$true] %s2147_s24 }
  0x35   : > { %2480 = vmatprep.subr.bf16.mxu0 %v2904_v2  ;;  %2815 = vmatprep.subr.bf16.mxu1 %v2904_v2  ;;  %v2909_v7 = vld [vmem:[%s3994_s1 + $0x20] sm:$0xff]   ;;  %v2911_v9 = vld [vmem:[%s3994_s1 + $0x18] sm:$0xff]   ;;  %v2912_v10 = vld [vmem:[%s3994_s1 + $0x50] sm:$0xff]   ;;  %s3915_s26 = scalar_lea.hbm %s3996_s3, %s2474_s13  ;;  %s3122_s9 = scalar_lea.vmem %s3917_s21, 128 }
  0x36   : > { %v2920_v11 = vld [vmem:[%s3351_s10 + $0x4] ss:$24 sps:$4 sm:$0xff]   ;;  %v2913_v13 = vld [vmem:[%s3994_s1 + $0x10] sm:$0xff]   ;;  %v2914_v14 = vld [vmem:[%s3994_s1 + $0x48] sm:$0xff]   ;;  %p3123_p13 = scmp.ne.s32.totalorder %s3917_s21, %s3122_s9  ;;  %s3237_s8 = smov [#allocation5]  }
  0x37   : > { %v2923_v12 = vld [vmem:[%s3351_s10 + $0x184] ss:$24 sps:$4 sm:$0xff]   ;;  %1304 = vmatprep.mubr.bf16.mxu0 %v2920_v11  ;;  %v2915_v15 = vld [vmem:[%s3994_s1 + $0x8] sm:$0xff]   ;;  %v2918_v19 = vld [vmem:[%s3351_s10] ss:$24 sps:$4 sm:$0xff]  }
  0x38   : > { %2481 = vmatpush3.bf16.msra.mxu0 %v2905_v3  ;;  %2823 = vmatpush3.bf16.msra.mxu1 %v2905_v3  ;;  %v2916_v16 = vld [vmem:[%s3994_s1 + $0x40] sm:$0xff]   ;;  %v2924_v18 = vld [vmem:[%s3994_s1 + $0xf8] sm:$0xff]   ;;  %v2928_v24 = vld [vmem:[%s3351_s10 + $0x34] ss:$24 sps:$4 sm:$0xff]   ;;  %p3124_p0 = pnand %p3123_p13, %p3315_p9 }
  0x39   : > { %2482 = vmatprep.subr.bf16.mxu0 %v2906_v4  ;;  %2816 = vmatprep.subr.bf16.mxu1 %v2906_v4  ;;  %v2917_v17 = vld [vmem:[%s3994_s1] sm:$0xff]   ;;  %v2926_v20 = vld [vmem:[%s3994_s1 + $0x178] sm:$0xff]   ;;  %v2930_v25 = vld [vmem:[%s3351_s10 + $0x1b4] ss:$24 sps:$4 sm:$0xff]  }
  0x3a   : > { %1368 = vmatprep.mubr.bf16.mxu1 %v2923_v12  ;;  %v2921_v21 = vld [vmem:[%s3351_s10 + $0x180] ss:$24 sps:$4 sm:$0xff]   ;;  %v2934_v26 = vld [vmem:[%s3994_s1 + $0xf0] sm:$0xff]   ;;  %v2944_v30 = vld [vmem:[%s3994_s1 + $0xe8] sm:$0xff]   ;;  %p3125_p2 = pneg %p3124_p0 }
  0x3b   : > { %v2925_v22 = vld [vmem:[%s3994_s1 + $0xb8] sm:$0xff]   ;;  %v2935_v27 = vld [vmem:[%s3994_s1 + $0xb0] sm:$0xff]   ;;  %v2946_v33 = vld [vmem:[%s3994_s1 + $0x168] sm:$0xff]  }
  0x3c   : > { %2483 = vmatpush3.bf16.msra.mxu0 %v2907_v5  ;;  %2824 = vmatpush3.bf16.msra.mxu1 %v2907_v5  ;;  %v2927_v23 = vld [vmem:[%s3994_s1 + $0x138] sm:$0xff]   ;;  %v2936_v28 = vld [vmem:[%s3994_s1 + $0x170] sm:$0xff]   ;;  %v2945_v36 = vld [vmem:[%s3994_s1 + $0xa8] sm:$0xff]  }
  0x3d   : > { %2484 = vmatprep.subr.bf16.mxu0 %v2908_v6  ;;  %2817 = vmatprep.subr.bf16.mxu1 %v2908_v6  ;;  %v2937_v29 = vld [vmem:[%s3994_s1 + $0x130] sm:$0xff]   ;;  %v2938_v34 = vld [vmem:[%s3351_s10 + $0x64] ss:$24 sps:$4 sm:$0xff]   ;;  %v2947_v37 = vld [vmem:[%s3994_s1 + $0x128] sm:$0xff]  }
  0x3e   : > { %v2932_v31 = vld [vmem:[%s3351_s10 + $0x30] ss:$24 sps:$4 sm:$0xff]   ;;  %v2940_v35 = vld [vmem:[%s3351_s10 + $0x1e4] ss:$24 sps:$4 sm:$0xff]   ;;  %v2942_v40 = vld [vmem:[%s3351_s10 + $0x60] ss:$24 sps:$4 sm:$0xff]  }
  0x3f   : > { %v2933_v32 = vld [vmem:[%s3351_s10 + $0x1b0] ss:$24 sps:$4 sm:$0xff]   ;;  %v2954_v38 = vld [vmem:[%s3994_s1 + $0xe0] sm:$0xff]   ;;  %v2948_v44 = vld [vmem:[%s3351_s10 + $0x94] ss:$24 sps:$4 sm:$0xff]  }
  0x40   : > { %2485 = vmatpush3.bf16.msra.mxu0 %v2909_v7  ;;  %2825 = vmatpush3.bf16.msra.mxu1 %v2909_v7  ;;  %v2956_v39 = vld [vmem:[%s3994_s1 + $0x160] sm:$0xff]   ;;  %v2950_v45 = vld [vmem:[%s3351_s10 + $0x214] ss:$24 sps:$4 sm:$0xff]   ;;  %v2964_v46 = vld [vmem:[%s3994_s1 + $0xd8] sm:$0xff]  }
  0x41   : > { %2486 = vmatprep.subr.bf16.mxu0 %v2910_v8  ;;  %2818 = vmatprep.subr.bf16.mxu1 %v2910_v8  ;;  %v2943_v41 = vld [vmem:[%s3351_s10 + $0x1e0] ss:$24 sps:$4 sm:$0xff]   ;;  %v2952_v50 = vld [vmem:[%s3351_s10 + $0x90] ss:$24 sps:$4 sm:$0xff]   ;;  %v2958_v53 = vld [vmem:[%s3351_s10 + $0xc4] ss:$24 sps:$4 sm:$0xff]  }
  0x42   : > { %v2955_v42 = vld [vmem:[%s3994_s1 + $0xa0] sm:$0xff]   ;;  %v2965_v47 = vld [vmem:[%s3994_s1 + $0x98] sm:$0xff]   ;;  %v2953_v51 = vld [vmem:[%s3351_s10 + $0x210] ss:$24 sps:$4 sm:$0xff]  }
  0x43   : > { %v2957_v43 = vld [vmem:[%s3994_s1 + $0x120] sm:$0xff]   ;;  %v2966_v48 = vld [vmem:[%s3994_s1 + $0x158] sm:$0xff]   ;;  %v2974_v52 = vld [vmem:[%s3994_s1 + $0xd0] sm:$0xff]  }
  0x44   : > { %2487 = vmatpush3.bf16.msra.mxu0 %v2911_v9  ;;  %2826 = vmatpush3.bf16.msra.mxu1 %v2911_v9  ;;  %v2967_v49 = vld [vmem:[%s3994_s1 + $0x118] sm:$0xff]   ;;  %v2975_v55 = vld [vmem:[%s3994_s1 + $0x90] sm:$0xff]   ;;  %v2984_v58 = vld [vmem:[%s3994_s1 + $0xc8] sm:$0xff]  }
  0x45   : > { %2488 = vmatprep.subr.bf16.mxu0 %v2912_v10  ;;  %2819 = vmatprep.subr.bf16.mxu1 %v2912_v10  ;;  %v2960_v54 = vld [vmem:[%s3351_s10 + $0x244] ss:$24 sps:$4 sm:$0xff]   ;;  %v2976_v56 = vld [vmem:[%s3994_s1 + $0x150] sm:$0xff]   ;;  %v2962_v59 = vld [vmem:[%s3351_s10 + $0xc0] ss:$24 sps:$4 sm:$0xff]  }
  0x46   : > { %v2977_v57 = vld [vmem:[%s3994_s1 + $0x110] sm:$0xff]   ;;  %v2963_v60 = vld [vmem:[%s3351_s10 + $0x240] ss:$24 sps:$4 sm:$0xff]   ;;  %v2985_v61 = vld [vmem:[%s3994_s1 + $0x88] sm:$0xff]  }
  0x47   : > { %v2968_v62 = vld [vmem:[%s3351_s10 + $0xf4] ss:$24 sps:$4 sm:$0xff]   ;;  %v2994_v2 = vld [vmem:[%s3994_s1 + $0xc0] sm:$0xff]   ;;  %v2972_v6 = vld [vmem:[%s3351_s10 + $0xf0] ss:$24 sps:$4 sm:$0xff]  }
  0x48   : > { %2489 = vmatpush3.bf16.msra.mxu0 %v2913_v13  ;;  %2827 = vmatpush3.bf16.msra.mxu1 %v2913_v13  ;;  %v2986_v63 = vld [vmem:[%s3994_s1 + $0x148] sm:$0xff]   ;;  %v2995_v3 = vld [vmem:[%s3994_s1 + $0x80] sm:$0xff]  }
  0x49   : > { %2490 = vmatprep.subr.bf16.mxu0 %v2914_v14  ;;  %2820 = vmatprep.subr.bf16.mxu1 %v2914_v14  ;;  %v2987_v0 = vld [vmem:[%s3994_s1 + $0x108] sm:$0xff]   ;;  %v2996_v4 = vld [vmem:[%s3994_s1 + $0x140] sm:$0xff]  }
  0x4a   : > { %v2970_v1 = vld [vmem:[%s3351_s10 + $0x274] ss:$24 sps:$4 sm:$0xff]   ;;  %v2997_v5 = vld [vmem:[%s3994_s1 + $0x100] sm:$0xff]   ;;  %v2973_v7 = vld [vmem:[%s3351_s10 + $0x270] ss:$24 sps:$4 sm:$0xff]  }
  0x4b   : > { %v2978_v8 = vld [vmem:[%s3351_s10 + $0x124] ss:$24 sps:$4 sm:$0xff]   ;;  %v2982_v10 = vld [vmem:[%s3351_s10 + $0x120] ss:$24 sps:$4 sm:$0xff]   ;;  %v2988_v12 = vld [vmem:[%s3351_s10 + $0x154] ss:$24 sps:$4 sm:$0xff]  }
  0x4c   : > { %2491 = vmatpush3.bf16.msra.mxu0 %v2915_v15  ;;  %2828 = vmatpush3.bf16.msra.mxu1 %v2915_v15  ;;  %v2980_v9 = vld [vmem:[%s3351_s10 + $0x2a4] ss:$24 sps:$4 sm:$0xff]   ;;  %v2983_v11 = vld [vmem:[%s3351_s10 + $0x2a0] ss:$24 sps:$4 sm:$0xff]   ;;  %v2990_v13 = vld [vmem:[%s3351_s10 + $0x2d4] ss:$24 sps:$4 sm:$0xff]  }
  0x4d   : > { %2492 = vmatprep.subr.bf16.mxu0 %v2916_v16  ;;  %2821 = vmatprep.subr.bf16.mxu1 %v2916_v16  ;;  %v2992_v14 = vld [vmem:[%s3351_s10 + $0x150] ss:$24 sps:$4 sm:$0xff]   ;;  %v3000_v16 = vld [vmem:[%s3351_s10 + $0xc] ss:$24 sps:$4 sm:$0xff]  }
  0x4e   : > { %v2993_v15 = vld [vmem:[%s3351_s10 + $0x2d0] ss:$24 sps:$4 sm:$0xff]  }
  0x50   : > { %2493 = vmatpush3.bf16.msra.mxu0 %v2917_v17  ;;  %2829 = vmatpush3.bf16.msra.mxu1 %v2917_v17  ;;  %v3003_v17 = vld [vmem:[%s3351_s10 + $0x14] ss:$24 sps:$4 sm:$0xff]  }
  0x51   : > { %2590 = vmatprep.subr.bf16.mxu1 %v2924_v18  ;;  %2702 = vmatprep.subr.bf16.mxu0 %v2926_v20  ;;  %v2998_v18 = vld [vmem:[%s3351_s10 + $0x8] ss:$24 sps:$4 sm:$0xff]   ;;  %v3004_v20 = vld [vmem:[%s3351_s10 + $0x3c] ss:$24 sps:$4 sm:$0xff]  }
  0x53   : > { %1305 = vmatmul.mubr.bf16.vlgmr.msra.gmra.mxu0 %v2918_v19  ;;  %1369 = vmatmul.mubr.bf16.vlgmr.msra.gmra.mxu1 %v2921_v21  ;;  %v3001_v19 = vld [vmem:[%s3351_s10 + $0x10] ss:$24 sps:$4 sm:$0xff]   ;;  %v3006_v21 = vld [vmem:[%s3351_s10 + $0x44] ss:$24 sps:$4 sm:$0xff]  }
  0x54   : > { %2591 = vmatpush3.bf16.msra.mxu1 %v2925_v22  ;;  %2703 = vmatpush3.bf16.msra.mxu0 %v2927_v23  ;;  %v3008_v22 = vld [vmem:[%s3351_s10 + $0x38] ss:$24 sps:$4 sm:$0xff]  }
  0x55   : > { %1312 = vmatprep.mubr.bf16.mxu0 %v2928_v24  ;;  %1376 = vmatprep.mubr.bf16.mxu1 %v2930_v25  ;;  %v3009_v23 = vld [vmem:[%s3351_s10 + $0x40] ss:$24 sps:$4 sm:$0xff]   ;;  %v3010_v24 = vld [vmem:[%s3351_s10 + $0x6c] ss:$24 sps:$4 sm:$0xff]  }
  0x56   : > { %2592 = vmatprep.subr.bf16.mxu1 %v2934_v26  ;;  %2704 = vmatprep.subr.bf16.mxu0 %v2936_v28  ;;  %v3012_v25 = vld [vmem:[%s3351_s10 + $0x74] ss:$24 sps:$4 sm:$0xff]   ;;  %v3014_v26 = vld [vmem:[%s3351_s10 + $0x68] ss:$24 sps:$4 sm:$0xff]  }
  0x57   : > { %v3016_v28 = vld [vmem:[%s3351_s10 + $0x9c] ss:$24 sps:$4 sm:$0xff]  }
  0x58   : > { %2593 = vmatpush3.bf16.msra.mxu1 %v2935_v27  ;;  %2705 = vmatpush3.bf16.msra.mxu0 %v2937_v29  ;;  %v3015_v27 = vld [vmem:[%s3351_s10 + $0x70] ss:$24 sps:$4 sm:$0xff]   ;;  %v3018_v29 = vld [vmem:[%s3351_s10 + $0xa4] ss:$24 sps:$4 sm:$0xff]  }
  0x59   : > { %2594 = vmatprep.subr.bf16.mxu1 %v2944_v30  ;;  %2706 = vmatprep.subr.bf16.mxu0 %v2946_v33  ;;  %v3020_v30 = vld [vmem:[%s3351_s10 + $0x98] ss:$24 sps:$4 sm:$0xff]   ;;  %v3024_v33 = vld [vmem:[%s3351_s10 + $0xd4] ss:$24 sps:$4 sm:$0xff]  }
  0x5b   : > { %1313 = vmatmul.mubr.bf16.gmra.mxu0 %v2932_v31  ;;  %1377 = vmatmul.mubr.bf16.gmra.mxu1 %v2933_v32  ;;  %v3021_v31 = vld [vmem:[%s3351_s10 + $0xa0] ss:$24 sps:$4 sm:$0xff]   ;;  %v3022_v32 = vld [vmem:[%s3351_s10 + $0xcc] ss:$24 sps:$4 sm:$0xff]  }
  0x5c   : > { %1320 = vmatprep.mubr.bf16.mxu0 %v2938_v34  ;;  %1384 = vmatprep.mubr.bf16.mxu1 %v2940_v35  ;;  %v3026_v34 = vld [vmem:[%s3351_s10 + $0xc8] ss:$24 sps:$4 sm:$0xff]  }
  0x5d   : > { %2595 = vmatpush3.bf16.msra.mxu1 %v2945_v36  ;;  %2707 = vmatpush3.bf16.msra.mxu0 %v2947_v37  ;;  %v3027_v35 = vld [vmem:[%s3351_s10 + $0xd0] ss:$24 sps:$4 sm:$0xff]   ;;  %v3028_v36 = vld [vmem:[%s3351_s10 + $0xfc] ss:$24 sps:$4 sm:$0xff]  }
  0x5e   : > { %2596 = vmatprep.subr.bf16.mxu1 %v2954_v38  ;;  %2708 = vmatprep.subr.bf16.mxu0 %v2956_v39  ;;  %v3030_v37 = vld [vmem:[%s3351_s10 + $0x104] ss:$24 sps:$4 sm:$0xff]   ;;  %v3032_v38 = vld [vmem:[%s3351_s10 + $0xf8] ss:$24 sps:$4 sm:$0xff]  }
  0x5f   : > { %v3033_v39 = vld [vmem:[%s3351_s10 + $0x100] ss:$24 sps:$4 sm:$0xff]  }
  0x61   : > { %2597 = vmatpush3.bf16.msra.mxu1 %v2955_v42  ;;  %2709 = vmatpush3.bf16.msra.mxu0 %v2957_v43  ;;  %v3038_v42 = vld [vmem:[%s3351_s10 + $0x128] ss:$24 sps:$4 sm:$0xff]  }
  0x62   : > { %2598 = vmatprep.subr.bf16.mxu1 %v2964_v46  ;;  %2710 = vmatprep.subr.bf16.mxu0 %v2966_v48  ;;  %v3039_v43 = vld [vmem:[%s3351_s10 + $0x130] ss:$24 sps:$4 sm:$0xff]   ;;  %v3046_v48 = vld [vmem:[%s3351_s10 + $0x18c] ss:$24 sps:$4 sm:$0xff]  }
  0x63   : > { %1321 = vmatmul.mubr.bf16.gmra.mxu0 %v2942_v40  ;;  %1385 = vmatmul.mubr.bf16.gmra.mxu1 %v2943_v41  ;;  %v3034_v40 = vld [vmem:[%s3351_s10 + $0x12c] ss:$24 sps:$4 sm:$0xff]   ;;  %v3044_v46 = vld [vmem:[%s3351_s10 + $0x158] ss:$24 sps:$4 sm:$0xff]  }
  0x64   : > { %1328 = vmatprep.mubr.bf16.mxu0 %v2948_v44  ;;  %1392 = vmatprep.mubr.bf16.mxu1 %v2950_v45  ;;  %v3036_v41 = vld [vmem:[%s3351_s10 + $0x134] ss:$24 sps:$4 sm:$0xff]   ;;  %v3042_v45 = vld [vmem:[%s3351_s10 + $0x164] ss:$24 sps:$4 sm:$0xff]  }
  0x65   : > { %2599 = vmatpush3.bf16.msra.mxu1 %v2965_v47  ;;  %2711 = vmatpush3.bf16.msra.mxu0 %v2967_v49  ;;  %v3040_v44 = vld [vmem:[%s3351_s10 + $0x15c] ss:$24 sps:$4 sm:$0xff]   ;;  %v3045_v47 = vld [vmem:[%s3351_s10 + $0x160] ss:$24 sps:$4 sm:$0xff]  }
  0x66   : > { %2600 = vmatprep.subr.bf16.mxu1 %v2974_v52  ;;  %2712 = vmatprep.subr.bf16.mxu0 %v2976_v56  ;;  %v3048_v49 = vld [vmem:[%s3351_s10 + $0x194] ss:$24 sps:$4 sm:$0xff]  }
  0x67   : > { %v3052_v52 = vld [vmem:[%s3351_s10 + $0x1bc] ss:$24 sps:$4 sm:$0xff]   ;;  %v3058_v56 = vld [vmem:[%s3351_s10 + $0x1ec] ss:$24 sps:$4 sm:$0xff]  }
  0x69   : > { %2601 = vmatpush3.bf16.msra.mxu1 %v2975_v55  ;;  %2713 = vmatpush3.bf16.msra.mxu0 %v2977_v57  ;;  %v3057_v55 = vld [vmem:[%s3351_s10 + $0x1c0] ss:$24 sps:$4 sm:$0xff]   ;;  %v3060_v57 = vld [vmem:[%s3351_s10 + $0x1f4] ss:$24 sps:$4 sm:$0xff]  }
  0x6a   : > { %2602 = vmatprep.subr.bf16.mxu1 %v2984_v58  ;;  %2714 = vmatprep.subr.bf16.mxu0 %v2986_v63  ;;  %v3062_v58 = vld [vmem:[%s3351_s10 + $0x1e8] ss:$24 sps:$4 sm:$0xff]  }
  0x6b   : > { %1329 = vmatmul.mubr.bf16.gmra.mxu0 %v2952_v50  ;;  %1393 = vmatmul.mubr.bf16.gmra.mxu1 %v2953_v51  ;;  %v3050_v50 = vld [vmem:[%s3351_s10 + $0x188] ss:$24 sps:$4 sm:$0xff]  }
  0x6c   : > { %1336 = vmatprep.mubr.bf16.mxu0 %v2958_v53  ;;  %1400 = vmatprep.mubr.bf16.mxu1 %v2960_v54  ;;  %v3051_v51 = vld [vmem:[%s3351_s10 + $0x190] ss:$24 sps:$4 sm:$0xff]   ;;  %v3054_v53 = vld [vmem:[%s3351_s10 + $0x1c4] ss:$24 sps:$4 sm:$0xff]   ;;  %v3069_v63 = vld [vmem:[%s3351_s10 + $0x220] ss:$24 sps:$4 sm:$0xff]  }
  0x6d   : > { %2603 = vmatpush3.bf16.msra.mxu1 %v2985_v61  ;;  %2715 = vmatpush3.bf16.msra.mxu0 %v2987_v0  ;;  %v3056_v54 = vld [vmem:[%s3351_s10 + $0x1b8] ss:$24 sps:$4 sm:$0xff]   ;;  %v3066_v61 = vld [vmem:[%s3351_s10 + $0x224] ss:$24 sps:$4 sm:$0xff]  }
  0x6e   : > { %2604 = vmatprep.subr.bf16.mxu1 %v2994_v2  ;;  %2716 = vmatprep.subr.bf16.mxu0 %v2996_v4  ;;  %v3070_v0 = vld [vmem:[%s3351_s10 + $0x24c] ss:$24 sps:$4 sm:$0xff]   ;;  %v3074_v2 = vld [vmem:[%s3351_s10 + $0x248] ss:$24 sps:$4 sm:$0xff]   ;;  %v3076_v4 = vld [vmem:[%s3351_s10 + $0x27c] ss:$24 sps:$4 sm:$0xff]  }
  0x71   : > { %2605 = vmatpush3.bf16.msra.mxu1 %v2995_v3  ;;  %2717 = vmatpush3.bf16.msra.mxu0 %v2997_v5  ;;  %v3075_v3 = vld [vmem:[%s3351_s10 + $0x250] ss:$24 sps:$4 sm:$0xff]   ;;  %v3078_v5 = vld [vmem:[%s3351_s10 + $0x284] ss:$24 sps:$4 sm:$0xff]  }
  0x73   : > { %1337 = vmatmul.mubr.bf16.gmra.mxu0 %v2962_v59  ;;  %1401 = vmatmul.mubr.bf16.gmra.mxu1 %v2963_v60  ;;  %v3063_v59 = vld [vmem:[%s3351_s10 + $0x1f0] ss:$24 sps:$4 sm:$0xff]   ;;  %v3064_v60 = vld [vmem:[%s3351_s10 + $0x21c] ss:$24 sps:$4 sm:$0xff]  }
  0x74   : > { %1344 = vmatprep.mubr.bf16.mxu0 %v2968_v62  ;;  %1408 = vmatprep.mubr.bf16.mxu1 %v2970_v1  ;;  %v3068_v62 = vld [vmem:[%s3351_s10 + $0x218] ss:$24 sps:$4 sm:$0xff]   ;;  %v3072_v1 = vld [vmem:[%s3351_s10 + $0x254] ss:$24 sps:$4 sm:$0xff]  }
  0x7b   : > { %1345 = vmatmul.mubr.bf16.gmra.mxu0 %v2972_v6  ;;  %1409 = vmatmul.mubr.bf16.gmra.mxu1 %v2973_v7  ;;  %v3080_v6 = vld [vmem:[%s3351_s10 + $0x278] ss:$24 sps:$4 sm:$0xff]  }
  0x7c   : > { %1352 = vmatprep.mubr.bf16.mxu0 %v2978_v8  ;;  %1416 = vmatprep.mubr.bf16.mxu1 %v2980_v9  ;;  %v3081_v7 = vld [vmem:[%s3351_s10 + $0x280] ss:$24 sps:$4 sm:$0xff]   ;;  %v3082_v8 = vld [vmem:[%s3351_s10 + $0x2ac] ss:$24 sps:$4 sm:$0xff]  }
  0x7d   : > { %v3084_v9 = vld [vmem:[%s3351_s10 + $0x2b4] ss:$24 sps:$4 sm:$0xff]  }
  0x83   : > { %1353 = vmatmul.mubr.bf16.gmra.mxu0 %v2982_v10  ;;  %1417 = vmatmul.mubr.bf16.gmra.mxu1 %v2983_v11  ;;  %v3086_v10 = vld [vmem:[%s3351_s10 + $0x2a8] ss:$24 sps:$4 sm:$0xff]  }
  0x84   : > { %1360 = vmatprep.mubr.bf16.mxu0 %v2988_v12  ;;  %1424 = vmatprep.mubr.bf16.mxu1 %v2990_v13  ;;  %v3087_v11 = vld [vmem:[%s3351_s10 + $0x2b0] ss:$24 sps:$4 sm:$0xff]   ;;  %v3088_v12 = vld [vmem:[%s3351_s10 + $0x2dc] ss:$24 sps:$4 sm:$0xff]  }
  0x85   : > { %v3090_v13 = vld [vmem:[%s3351_s10 + $0x2e4] ss:$24 sps:$4 sm:$0xff]  }
  0x8b   : > { %1361 = vmatmul.mubr.bf16.gmra.mxu0 %v2992_v14  ;;  %1425 = vmatmul.mubr.bf16.gmra.mxu1 %v2993_v15  ;;  %v3092_v14 = vld [vmem:[%s3351_s10 + $0x2d8] ss:$24 sps:$4 sm:$0xff]  }
  0x8c   : > { %1465 = vmatprep.mubr.bf16.mxu1 %v3000_v16  ;;  %1626 = vmatprep.mubr.bf16.mxu0 %v3003_v17  ;;  %v3093_v15 = vld [vmem:[%s3351_s10 + $0x2e0] ss:$24 sps:$4 sm:$0xff]   ;;  %s2326_s10 = sshll.u32 %s3224_s18, 5 }
  0x8d   : > { %p303_p8 = scmp.lt.s32.totalorder %s2326_s10, 127 }
  0x8f   : > { %s4015_s10 = smov (!%p303_p8, %s2326_s10), 127 }
  0x90   : > { %s2327_s7 = sshll.u32 %s4015_s10, 3  ;;  %s3923_s10 = scalar_lea.hbm %s3997_s4, %s2474_s13 }
  0x91   : > { %s3699_s11 = scalar_lea.vmem %s3995_s2, %s2327_s7  ;;  %s2110_s7 = scalar_lea.sflag [#allocation4], %s3347_s6 }
  0x93   : > { %1466 = vmatmul.mubr.bf16.vlgmr.msra.gmra.mxu1 %v2998_v18  ;;  %1627 = vmatmul.mubr.bf16.vlgmr.msra.gmra.mxu0 %v3001_v19 }
  0x94   : > { %1473 = vmatprep.mubr.bf16.mxu1 %v3004_v20  ;;  %1634 = vmatprep.mubr.bf16.mxu0 %v3006_v21 }
  0x9b   : > { %1474 = vmatmul.mubr.bf16.gmra.mxu1 %v3008_v22  ;;  %1635 = vmatmul.mubr.bf16.gmra.mxu0 %v3009_v23 }
  0x9c   : > { %1481 = vmatprep.mubr.bf16.mxu1 %v3010_v24  ;;  %1642 = vmatprep.mubr.bf16.mxu0 %v3012_v25 }
  0xa3   : > { %1482 = vmatmul.mubr.bf16.gmra.mxu1 %v3014_v26  ;;  %1643 = vmatmul.mubr.bf16.gmra.mxu0 %v3015_v27 }
  0xa4   : > { %1489 = vmatprep.mubr.bf16.mxu1 %v3016_v28  ;;  %1650 = vmatprep.mubr.bf16.mxu0 %v3018_v29 }
  0xab   : > { %1490 = vmatmul.mubr.bf16.gmra.mxu1 %v3020_v30  ;;  %1651 = vmatmul.mubr.bf16.gmra.mxu0 %v3021_v31 }
  0xac   : > { %1497 = vmatprep.mubr.bf16.mxu1 %v3022_v32  ;;  %1658 = vmatprep.mubr.bf16.mxu0 %v3024_v33 }
  0xb3   : > { %1498 = vmatmul.mubr.bf16.gmra.mxu1 %v3026_v34  ;;  %1659 = vmatmul.mubr.bf16.gmra.mxu0 %v3027_v35 }
  0xb4   : > { %1505 = vmatprep.mubr.bf16.mxu1 %v3028_v36  ;;  %1666 = vmatprep.mubr.bf16.mxu0 %v3030_v37 }
  0xbb   : > { %1506 = vmatmul.mubr.bf16.gmra.mxu1 %v3032_v38  ;;  %1667 = vmatmul.mubr.bf16.gmra.mxu0 %v3033_v39 }
  0xbc   : > { %1513 = vmatprep.mubr.bf16.mxu1 %v3034_v40  ;;  %1674 = vmatprep.mubr.bf16.mxu0 %v3036_v41 }
  0xc3   : > { %1514 = vmatmul.mubr.bf16.gmra.mxu1 %v3038_v42  ;;  %1675 = vmatmul.mubr.bf16.gmra.mxu0 %v3039_v43 }
  0xc4   : > { %1521 = vmatprep.mubr.bf16.mxu1 %v3040_v44  ;;  %1682 = vmatprep.mubr.bf16.mxu0 %v3042_v45 }
  0xcb   : > { %1522 = vmatmul.mubr.bf16.gmra.mxu1 %v3044_v46  ;;  %1683 = vmatmul.mubr.bf16.gmra.mxu0 %v3045_v47 }
  0xcc   : > { %1529 = vmatprep.mubr.bf16.mxu1 %v3046_v48  ;;  %1690 = vmatprep.mubr.bf16.mxu0 %v3048_v49 }
  0xd3   : > { %1530 = vmatmul.mubr.bf16.gmra.mxu1 %v3050_v50  ;;  %1691 = vmatmul.mubr.bf16.gmra.mxu0 %v3051_v51 }
  0xd4   : > { %1537 = vmatprep.mubr.bf16.mxu1 %v3052_v52  ;;  %1698 = vmatprep.mubr.bf16.mxu0 %v3054_v53 }
  0xdb   : > { %1538 = vmatmul.mubr.bf16.gmra.mxu1 %v3056_v54  ;;  %1699 = vmatmul.mubr.bf16.gmra.mxu0 %v3057_v55 }
  0xdc   : > { %1545 = vmatprep.mubr.bf16.mxu1 %v3058_v56  ;;  %1706 = vmatprep.mubr.bf16.mxu0 %v3060_v57 }
  0xe3   : > { %1546 = vmatmul.mubr.bf16.gmra.mxu1 %v3062_v58  ;;  %1707 = vmatmul.mubr.bf16.gmra.mxu0 %v3063_v59 }
  0xe4   : > { %1553 = vmatprep.mubr.bf16.mxu1 %v3064_v60  ;;  %1714 = vmatprep.mubr.bf16.mxu0 %v3066_v61 }
  0xeb   : > { %1554 = vmatmul.mubr.bf16.gmra.mxu1 %v3068_v62  ;;  %1715 = vmatmul.mubr.bf16.gmra.mxu0 %v3069_v63 }
  0xec   : > { %1561 = vmatprep.mubr.bf16.mxu1 %v3070_v0  ;;  %1722 = vmatprep.mubr.bf16.mxu0 %v3072_v1 }
  0xf3   : > { %1562 = vmatmul.mubr.bf16.gmra.mxu1 %v3074_v2  ;;  %1723 = vmatmul.mubr.bf16.gmra.mxu0 %v3075_v3 }
  0xf4   : > { %1569 = vmatprep.mubr.bf16.mxu1 %v3076_v4  ;;  %1730 = vmatprep.mubr.bf16.mxu0 %v3078_v5 }
  0xfb   : > { %1570 = vmatmul.mubr.bf16.gmra.mxu1 %v3080_v6  ;;  %1731 = vmatmul.mubr.bf16.gmra.mxu0 %v3081_v7 }
  0xfc   : > { %1577 = vmatprep.mubr.bf16.mxu1 %v3082_v8  ;;  %1738 = vmatprep.mubr.bf16.mxu0 %v3084_v9 }
 0x103   : > { %1578 = vmatmul.mubr.bf16.gmra.mxu1 %v3086_v10  ;;  %1739 = vmatmul.mubr.bf16.gmra.mxu0 %v3087_v11 }
 0x104   : > { %1585 = vmatprep.mubr.bf16.mxu1 %v3088_v12  ;;  %1746 = vmatprep.mubr.bf16.mxu0 %v3090_v13 }
 0x10b   : > { %1586 = vmatmul.mubr.bf16.gmra.mxu1 %v3092_v14  ;;  %1747 = vmatmul.mubr.bf16.gmra.mxu0 %v3093_v15 }
 0x113   : > { %v3597_v16 = vpop.f32.mrf.mxu0  ;;  %v2542_v17 = vpop.f32.mrf.mxu1 }
 0x115   : > { %v3599_v18 = vpop.f32.mrf.mxu0  ;;  %v2543_v19 = vpop.f32.mrf.mxu1 }
 0x116   : > { %v3601_v20 = vadd.f32 %v2543_v19, %v2542_v17 }
 0x117   : > { %v3603_v21 = vpop.f32.mrf.mxu0  ;;  %v2545_v22 = vpop.f32.mrf.mxu1 }
 0x119   : > { %v3605_v23 = vpop.f32.mrf.mxu0  ;;  %v2546_v24 = vpop.f32.mrf.mxu1 }
 0x11a   : > { %v3607_v25 = vadd.f32 %v2546_v24, %v2545_v22 }
 0x11b   : > { %v3609_v26 = vpop.f32.mrf.mxu0  ;;  %v2548_v27 = vpop.f32.mrf.mxu1 }
 0x11d   : > { %v3611_v28 = vpop.f32.mrf.mxu0  ;;  %v2549_v29 = vpop.f32.mrf.mxu1 }
 0x11e   : > { %v3613_v30 = vadd.f32 %v2549_v29, %v2548_v27 }
 0x11f   : > { %v3615_v31 = vpop.f32.mrf.mxu0  ;;  %v2551_v32 = vpop.f32.mrf.mxu1 }
 0x121   : > { %v3617_v33 = vpop.f32.mrf.mxu0  ;;  %v2552_v34 = vpop.f32.mrf.mxu1 }
 0x122   : > { %v3619_v35 = vadd.f32 %v2552_v34, %v2551_v32 }
 0x123   : > { %v3621_v36 = vpop.f32.mrf.mxu0  ;;  %v2554_v37 = vpop.f32.mrf.mxu1 }
 0x125   : > { %v3623_v38 = vpop.f32.mrf.mxu0  ;;  %v2555_v39 = vpop.f32.mrf.mxu1 }
 0x126   : > { %v3625_v40 = vadd.f32 %v2555_v39, %v2554_v37 }
 0x127   : > { %v3627_v41 = vpop.f32.mrf.mxu0  ;;  %v2557_v42 = vpop.f32.mrf.mxu1 }
 0x129   : > { %v3629_v43 = vpop.f32.mrf.mxu0  ;;  %v2558_v44 = vpop.f32.mrf.mxu1 }
 0x12a   : > { %v3631_v45 = vadd.f32 %v2558_v44, %v2557_v42 }
 0x12b   : > { %v3633_v46 = vpop.f32.mrf.mxu0  ;;  %v2560_v47 = vpop.f32.mrf.mxu1 }
 0x12d   : > { %v3635_v48 = vpop.f32.mrf.mxu0  ;;  %v2561_v49 = vpop.f32.mrf.mxu1 }
 0x12e   : > { %v3637_v50 = vadd.f32 %v2561_v49, %v2560_v47 }
 0x12f   : > { %v3639_v51 = vpop.f32.mrf.mxu0  ;;  %v2563_v52 = vpop.f32.mrf.mxu1 }
 0x131   : > { %v3641_v53 = vpop.f32.mrf.mxu0  ;;  %v2564_v54 = vpop.f32.mrf.mxu1 }
 0x132   : > { %v3643_v55 = vadd.f32 %v2564_v54, %v2563_v52 }
 0x133   : > { %v3645_v56 = vpop.f32.mrf.mxu0  ;;  %v2566_v57 = vpop.f32.mrf.mxu1 }
 0x135   : > { %v3647_v58 = vpop.f32.mrf.mxu0  ;;  %v2567_v59 = vpop.f32.mrf.mxu1 }
 0x136   : > { %v3649_v60 = vadd.f32 %v2567_v59, %v2566_v57 }
 0x137   : > { %v3651_v61 = vpop.f32.mrf.mxu0  ;;  %v2569_v62 = vpop.f32.mrf.mxu1 }
 0x139   : > { %v3653_v63 = vpop.f32.mrf.mxu0  ;;  %v2570_v0 = vpop.f32.mrf.mxu1 }
 0x13a   : > { %v3655_v1 = vadd.f32 %v2570_v0, %v2569_v62 }
 0x13b   : > { %v3657_v2 = vpop.f32.mrf.mxu0  ;;  %v2572_v3 = vpop.f32.mrf.mxu1 }
 0x13d   : > { %v3659_v4 = vpop.f32.mrf.mxu0  ;;  %v2573_v5 = vpop.f32.mrf.mxu1 }
 0x13e   : > { %v3661_v6 = vadd.f32 %v2573_v5, %v2572_v3  ;;  %v2496_v3 = vadd.f32 %v3599_v18, %v3597_v16 }
 0x13f   : > { %v3663_v7 = vpop.f32.mrf.mxu0  ;;  %v2575_v8 = vpop.f32.mrf.mxu1 }
 0x141   : > { %v3665_v9 = vpop.f32.mrf.mxu0  ;;  %v2576_v10 = vpop.f32.mrf.mxu1 }
 0x142   : > { %v3667_v11 = vadd.f32 %v2576_v10, %v2575_v8 }
 0x143   : > { %v3669_v12 = vpop.f32.mrf.mxu0  ;;  %v2578_v13 = vpop.f32.mrf.mxu1 }
 0x145   : > { %v3671_v14 = vpop.f32.mrf.mxu0  ;;  %v2579_v15 = vpop.f32.mrf.mxu1 }
 0x146   : > { %v3673_v17 = vadd.f32 %v2579_v15, %v2578_v13 }
 0x147   : > { %v3675_v19 = vpop.f32.mrf.mxu0  ;;  %v2581_v22 = vpop.f32.mrf.mxu1 }
 0x149   : > { %v3677_v24 = vpop.f32.mrf.mxu0  ;;  %v2582_v27 = vpop.f32.mrf.mxu1 }
 0x14a   : > { %v3679_v29 = vadd.f32 %v2582_v27, %v2581_v22 }
 0x14b   : > { %v3681_v32 = vpop.f32.mrf.mxu0  ;;  %v2584_v34 = vpop.f32.mrf.mxu1 }
 0x14d   : > { %v3684_v37 = vpop.f32.mrf.mxu0  ;;  %v2585_v39 = vpop.f32.mrf.mxu1 }
 0x14e   : > { %v3686_v42 = vadd.f32 %v2585_v39, %v2584_v34  ;;  %v2499_v34 = vadd.f32 %v3605_v23, %v3603_v21 }
 0x14f   : > { %v3688_v44 = vpop.f32.mrf.mxu0  ;;  %v2587_v47 = vpop.f32.mrf.mxu1 }
 0x150   : > { %4003 = vst [vmem:[#allocation11_spill] sm:$0xff] %v3686_v42 }
 0x151   : > { %v3690_v49 = vpop.f32.mrf.mxu0  ;;  %v2588_v52 = vpop.f32.mrf.mxu1 }
 0x152   : > { %v3692_v54 = vadd.f32 %v2588_v52, %v2587_v47 }
 0x153   : > { %v2606_v57 = vpop.f32.mrf.mxu1  ;;  %v2718_v59 = vpop.f32.mrf.mxu0 }
 0x154   : > { %4004 = vst [vmem:[#allocation12_spill] sm:$0xff] %v3692_v54 }
 0x155   : > { %v2607_v62 = vpop.f32.mrf.mxu1  ;;  %v2719_v0 = vpop.f32.mrf.mxu0 }
 0x156   : > { %v2608_v5 = vadd.f32 %v2607_v62, %v2606_v57  ;;  %v2720_v15 = vadd.f32 %v2719_v0, %v2718_v59  ;;  %v2502_v0 = vadd.f32 %v3611_v28, %v3609_v26 }
 0x157   : > { %v2609_v8 = vpop.f32.mrf.mxu1  ;;  %v2721_v10 = vpop.f32.mrf.mxu0 }
 0x158   : > { %v1468_v13 = vadd.f32 %v2608_v5, %v2496_v3 }
 0x159   : > { %v2610_v22 = vpop.f32.mrf.mxu1  ;;  %v2722_v27 = vpop.f32.mrf.mxu0 }
 0x15a   : > { %v1629_v16 = vadd.f32 %v2720_v15, %v1468_v13  ;;  %v2611_v18 = vadd.f32 %v2610_v22, %v2609_v8  ;;  %v2723_v57 = vadd.f32 %v2722_v27, %v2721_v10  ;;  %v2505_v10 = vadd.f32 %v3617_v33, %v3615_v31 }
 0x15b   : > { %v2612_v39 = vpop.f32.mrf.mxu1  ;;  %v2724_v47 = vpop.f32.mrf.mxu0 }
 0x15c   : > { %1760 = vst.msk [vmem:[%s3699_s11] sm:$0xff] %vm1759_vm0, %v1629_v16  ;;  %v1471_v52 = vadd.f32 %v2611_v18, %v2499_v34 }
 0x15d   : > { %v2613_v59 = vpop.f32.mrf.mxu1  ;;  %v2725_v62 = vpop.f32.mrf.mxu0 }
 0x15e   : > { %v1632_v3 = vadd.f32 %v2723_v57, %v1471_v52  ;;  %v2614_v5 = vadd.f32 %v2613_v59, %v2612_v39  ;;  %v2726_v23 = vadd.f32 %v2725_v62, %v2724_v47  ;;  %v2508_v39 = vadd.f32 %v3623_v38, %v3621_v36 }
 0x15f   : > { %v2615_v54 = vpop.f32.mrf.mxu1  ;;  %v2727_v42 = vpop.f32.mrf.mxu0 }
 0x160   : > { %1761 = vst.msk [vmem:[%s3699_s11 + $0x8] sm:$0xff] %vm1759_vm0, %v1632_v3  ;;  %v1476_v21 = vadd.f32 %v2614_v5, %v2502_v0 }
 0x161   : > { %v2616_v8 = vpop.f32.mrf.mxu1  ;;  %v2728_v13 = vpop.f32.mrf.mxu0 }
 0x162   : > { %v1637_v15 = vadd.f32 %v2726_v23, %v1476_v21  ;;  %v2617_v22 = vadd.f32 %v2616_v8, %v2615_v54  ;;  %v2729_v28 = vadd.f32 %v2728_v13, %v2727_v42  ;;  %v2511_v42 = vadd.f32 %v3629_v43, %v3627_v41 }
 0x163   : > { %v2618_v27 = vpop.f32.mrf.mxu1  ;;  %v2730_v34 = vpop.f32.mrf.mxu0  ;;  %v2514_v13 = vadd.f32 %v3635_v48, %v3633_v46 }
 0x164   : > { %1762 = vst.msk [vmem:[%s3699_s11 + $0x10] sm:$0xff] %vm1759_vm0, %v1637_v15  ;;  %v1479_v26 = vadd.f32 %v2617_v22, %v2505_v10 }
 0x165   : > { %v2619_v16 = vpop.f32.mrf.mxu1  ;;  %v2731_v18 = vpop.f32.mrf.mxu0 }
 0x166   : > { %v1640_v47 = vadd.f32 %v2729_v28, %v1479_v26  ;;  %v2620_v52 = vadd.f32 %v2619_v16, %v2618_v27  ;;  %v2732_v33 = vadd.f32 %v2731_v18, %v2730_v34  ;;  %v2517_v28 = vadd.f32 %v3641_v53, %v3639_v51 }
 0x167   : > { %v2621_v57 = vpop.f32.mrf.mxu1  ;;  %v2733_v59 = vpop.f32.mrf.mxu0 }
 0x168   : > { %1763 = vst.msk [vmem:[%s3699_s11 + $0x18] sm:$0xff] %vm1759_vm0, %v1640_v47  ;;  %v1484_v31 = vadd.f32 %v2620_v52, %v2508_v39 }
 0x169   : > { %v2622_v54 = vpop.f32.mrf.mxu1  ;;  %v2734_v62 = vpop.f32.mrf.mxu0 }
 0x16a   : > { %v1645_v0 = vadd.f32 %v2732_v33, %v1484_v31  ;;  %v2623_v3 = vadd.f32 %v2622_v54, %v2621_v57  ;;  %v2735_v38 = vadd.f32 %v2734_v62, %v2733_v59  ;;  %v2520_v59 = vadd.f32 %v3647_v58, %v3645_v56 }
 0x16b   : > { %v2624_v5 = vpop.f32.mrf.mxu1  ;;  %v2736_v21 = vpop.f32.mrf.mxu0 }
 0x16c   : > { %1764 = vst.msk [vmem:[%s3699_s11 + $0x20] sm:$0xff] %vm1759_vm0, %v1645_v0  ;;  %v1487_v36 = vadd.f32 %v2623_v3, %v2511_v42  ;;  %v2523_v3 = vadd.f32 %v3653_v63, %v3651_v61 }
 0x16d   : > { %v2625_v23 = vpop.f32.mrf.mxu1  ;;  %v2737_v8 = vpop.f32.mrf.mxu0 }
 0x16e   : > { %v1648_v10 = vadd.f32 %v2735_v38, %v1487_v36  ;;  %v2626_v15 = vadd.f32 %v2625_v23, %v2624_v5  ;;  %v2738_v43 = vadd.f32 %v2737_v8, %v2736_v21 }
 0x16f   : > { %v2627_v22 = vpop.f32.mrf.mxu1  ;;  %v2739_v27 = vpop.f32.mrf.mxu0 }
 0x170   : > { %1765 = vst.msk [vmem:[%s3699_s11 + $0x28] sm:$0xff] %vm1759_vm0, %v1648_v10  ;;  %v1492_v41 = vadd.f32 %v2626_v15, %v2514_v13  ;;  %v2526_v13 = vadd.f32 %v3659_v4, %v3657_v2 }
 0x171   : > { %v2628_v34 = vpop.f32.mrf.mxu1  ;;  %v2740_v26 = vpop.f32.mrf.mxu0 }
 0x172   : > { %v1653_v16 = vadd.f32 %v2738_v43, %v1492_v41  ;;  %v2629_v18 = vadd.f32 %v2628_v34, %v2627_v22  ;;  %v2741_v48 = vadd.f32 %v2740_v26, %v2739_v27  ;;  %v2529_v34 = vadd.f32 %v3665_v9, %v3663_v7 }
 0x173   : > { %v2630_v39 = vpop.f32.mrf.mxu1  ;;  %v2742_v47 = vpop.f32.mrf.mxu0 }
 0x174   : > { %1766 = vst.msk [vmem:[%s3699_s11 + $0x30] sm:$0xff] %vm1759_vm0, %v1653_v16  ;;  %v1495_v46 = vadd.f32 %v2629_v18, %v2517_v28 }
 0x175   : > { %v2631_v52 = vpop.f32.mrf.mxu1  ;;  %v2743_v57 = vpop.f32.mrf.mxu0 }
 0x176   : > { %v1656_v31 = vadd.f32 %v2741_v48, %v1495_v46  ;;  %v2632_v33 = vadd.f32 %v2631_v52, %v2630_v39  ;;  %v2744_v53 = vadd.f32 %v2743_v57, %v2742_v47  ;;  %v2532_v46 = vadd.f32 %v3671_v14, %v3669_v12 }
 0x177   : > { %v2633_v54 = vpop.f32.mrf.mxu1  ;;  %v2745_v62 = vpop.f32.mrf.mxu0 }
 0x178   : > { %1767 = vst.msk [vmem:[%s3699_s11 + $0x38] sm:$0xff] %vm1759_vm0, %v1656_v31  ;;  %v1500_v51 = vadd.f32 %v2632_v33, %v2520_v59 }
 0x179   : > { %v2634_v42 = vpop.f32.mrf.mxu1  ;;  %v2746_v0 = vpop.f32.mrf.mxu0 }
 0x17a   : > { %v1661_v5 = vadd.f32 %v2744_v53, %v1500_v51  ;;  %v2635_v21 = vadd.f32 %v2634_v42, %v2633_v54  ;;  %v2747_v58 = vadd.f32 %v2746_v0, %v2745_v62  ;;  %v2535_v54 = vadd.f32 %v3677_v24, %v3675_v19 }
 0x17b   : > { %v2636_v36 = vpop.f32.mrf.mxu1  ;;  %v2748_v38 = vpop.f32.mrf.mxu0 }
 0x17c   : > { %1768 = vst.msk [vmem:[%s3699_s11 + $0x40] sm:$0xff] %vm1759_vm0, %v1661_v5  ;;  %v1503_v56 = vadd.f32 %v2635_v21, %v2523_v3  ;;  %v2538_v5 = vadd.f32 %v3684_v37, %v3681_v32 }
 0x17d   : > { %v2637_v23 = vpop.f32.mrf.mxu1  ;;  %v2749_v8 = vpop.f32.mrf.mxu0 }
 0x17e   : > { %v1664_v10 = vadd.f32 %v2747_v58, %v1503_v56  ;;  %v2638_v15 = vadd.f32 %v2637_v23, %v2636_v36  ;;  %v2750_v63 = vadd.f32 %v2749_v8, %v2748_v38  ;;  %v2541_v8 = vadd.f32 %v3690_v49, %v3688_v44 }
 0x17f   : > { %v2639_v22 = vpop.f32.mrf.mxu1  ;;  %v2751_v27 = vpop.f32.mrf.mxu0 }
 0x180   : > { %1769 = vst.msk [vmem:[%s3699_s11 + $0x48] sm:$0xff] %vm1759_vm0, %v1664_v10  ;;  %v1508_v61 = vadd.f32 %v2638_v15, %v2526_v13 }
 0x181   : > { %v2640_v41 = vpop.f32.mrf.mxu1  ;;  %v2752_v43 = vpop.f32.mrf.mxu0 }
 0x182   : > { %v1669_v26 = vadd.f32 %v2750_v63, %v1508_v61  ;;  %v2641_v28 = vadd.f32 %v2640_v41, %v2639_v22  ;;  %v2753_v4 = vadd.f32 %v2752_v43, %v2751_v27 }
 0x183   : > { %v2642_v16 = vpop.f32.mrf.mxu1  ;;  %v2754_v18 = vpop.f32.mrf.mxu0 }
 0x184   : > { %1770 = vst.msk [vmem:[%s3699_s11 + $0x50] sm:$0xff] %vm1759_vm0, %v1669_v26  ;;  %v1511_v2 = vadd.f32 %v2641_v28, %v2529_v34 }
 0x185   : > { %v2643_v39 = vpop.f32.mrf.mxu1  ;;  %v2755_v47 = vpop.f32.mrf.mxu0 }
 0x186   : > { %v1672_v48 = vadd.f32 %v2753_v4, %v1511_v2  ;;  %v2644_v52 = vadd.f32 %v2643_v39, %v2642_v16  ;;  %v2756_v9 = vadd.f32 %v2755_v47, %v2754_v18  ;;  %v1897_v39 = vld [vmem:[%s3699_s11 + $0x8] sm:$0xff] }
 0x187   : > { %v2645_v57 = vpop.f32.mrf.mxu1  ;;  %v2757_v59 = vpop.f32.mrf.mxu0 }
 0x188   : > { %1771 = vst.msk [vmem:[%s3699_s11 + $0x58] sm:$0xff] %vm1759_vm0, %v1672_v48  ;;  %v1516_v7 = vadd.f32 %v2644_v52, %v2532_v46 }
 0x189   : > { %v2646_v31 = vpop.f32.mrf.mxu1  ;;  %v2758_v33 = vpop.f32.mrf.mxu0 }
 0x18a   : > { %v1677_v62 = vadd.f32 %v2756_v9, %v1516_v7  ;;  %v2647_v51 = vadd.f32 %v2646_v31, %v2645_v57  ;;  %v2759_v14 = vadd.f32 %v2758_v33, %v2757_v59  ;;  %v1896_v57 = vld [vmem:[%s3699_s11] sm:$0xff]  ;;  %v1999_v7 = vmul.f32 %v1897_v39, %v1897_v39  ;;  %v1898_v9 = vld [vmem:[%s3699_s11 + $0x10] sm:$0xff] }
 0x18b   : > { %v2648_v53 = vpop.f32.mrf.mxu1  ;;  %v2760_v42 = vpop.f32.mrf.mxu0 }
 0x18c   : > { %1772 = vst.msk [vmem:[%s3699_s11 + $0x60] sm:$0xff] %vm1759_vm0, %v1677_v62  ;;  %v1519_v12 = vadd.f32 %v2647_v51, %v2535_v54  ;;  %v1998_v51 = vmul.f32 %v1896_v57, %v1896_v57 }
 0x18d   : > { %v2649_v0 = vpop.f32.mrf.mxu1  ;;  %v2761_v3 = vpop.f32.mrf.mxu0 }
 0x18e   : > { %v1680_v21 = vadd.f32 %v2759_v14, %v1519_v12  ;;  %v2650_v36 = vadd.f32 %v2649_v0, %v2648_v53  ;;  %v2762_v24 = vadd.f32 %v2761_v3, %v2760_v42  ;;  %v1930_v12 = vsel %vm1759_vm0, %v1897_v39, 0.0  ;;  %v1900_v0 = vld [vmem:[%s3699_s11 + $0x20] sm:$0xff]  ;;  %v1903_v39 = vld [vmem:[%s3699_s11 + $0x38] sm:$0xff] }
 0x18f   : > { %v2651_v38 = vpop.f32.mrf.mxu1  ;;  %v2763_v56 = vpop.f32.mrf.mxu0  ;;  %v2000_v14 = vmul.f32 %v1898_v9, %v1898_v9 }
 0x190   : > { %1773 = vst.msk [vmem:[%s3699_s11 + $0x68] sm:$0xff] %vm1759_vm0, %v1680_v21  ;;  %v1524_v19 = vadd.f32 %v2650_v36, %v2538_v5  ;;  %v1929_v21 = vsel %vm1759_vm0, %v1896_v57, 0.0  ;;  %v2031_v36 = vsel %vm1759_vm0, %v1999_v7, 0.0  ;;  %v1904_v57 = vld [vmem:[%s3699_s11 + $0x40] sm:$0xff] }
 0x191   : > { %v2652_v58 = vpop.f32.mrf.mxu1  ;;  %v2764_v23 = vpop.f32.mrf.mxu0 }
 0x192   : > { %v1685_v13 = vadd.f32 %v2762_v24, %v1524_v19  ;;  %v2653_v10 = vadd.f32 %v2652_v58, %v2651_v38  ;;  %v2765_v37 = vadd.f32 %v2764_v23, %v2763_v56  ;;  %v1901_v24 = vld [vmem:[%s3699_s11 + $0x28] sm:$0xff] }
 0x193   : > { %v2654_v15 = vpop.f32.mrf.mxu1  ;;  %v2766_v22 = vpop.f32.mrf.mxu0 }
 0x194   : > { %1774 = vst.msk [vmem:[%s3699_s11 + $0x70] sm:$0xff] %vm1759_vm0, %v1685_v13  ;;  %v1527_v32 = vadd.f32 %v2653_v10, %v2541_v8  ;;  %v2030_v8 = vsel %vm1759_vm0, %v1998_v51, 0.0  ;;  %v1931_v13 = vadd.f32 %v1930_v12, %v1929_v21  ;;  %v2002_v10 = vmul.f32 %v1900_v0, %v1900_v0  ;;  %v1905_v51 = vld [vmem:[%s3699_s11 + $0x48] sm:$0xff] }
 0x195   : > { %v2655_v27 = vpop.f32.mrf.mxu1  ;;  %v2767_v61 = vpop.f32.mrf.mxu0  ;;  %v1942_v21 = vsel %vm1759_vm0, %v1903_v39, 0.0 }
 0x196   : > { %v1688_v63 = vadd.f32 %v2765_v37, %v1527_v32  ;;  %v2656_v41 = vadd.f32 %v2655_v27, %v2654_v15  ;;  %v2768_v49 = vadd.f32 %v2767_v61, %v2766_v22  ;;  %v2033_v32 = vsel %vm1759_vm0, %v2000_v14, 0.0 }
 0x197   : > { %v2657_v43 = vpop.f32.mrf.mxu1  ;;  %v2769_v34 = vpop.f32.mrf.mxu0  ;;  %v2006_v14 = vmul.f32 %v1904_v57, %v1904_v57 }
 0x198   : > { %1775 = vst.msk [vmem:[%s3699_s11 + $0x78] sm:$0xff] %vm1759_vm0, %v1688_v63  ;;  %v1532_v44 = vadd.f32 %v2656_v41, %v3601_v20  ;;  %v2032_v63 = vadd.f32 %v2031_v36, %v2030_v8  ;;  %v1944_v8 = vsel %vm1759_vm0, %v1904_v57, 0.0 }
 0x199   : > { %v2658_v26 = vpop.f32.mrf.mxu1  ;;  %v2770_v28 = vpop.f32.mrf.mxu0 }
 0x19a   : > { %v1693_v16 = vadd.f32 %v2768_v49, %v1532_v44  ;;  %v2659_v18 = vadd.f32 %v2658_v26, %v2657_v43  ;;  %v2771_v46 = vadd.f32 %v2770_v28, %v2769_v34  ;;  %v2003_v43 = vmul.f32 %v1901_v24, %v1901_v24  ;;  %v1902_v34 = vld [vmem:[%s3699_s11 + $0x30] sm:$0xff] }
 0x19b   : > { %v2660_v2 = vpop.f32.mrf.mxu1  ;;  %v2772_v4 = vpop.f32.mrf.mxu0  ;;  %v1936_v26 = vsel %vm1759_vm0, %v1900_v0, 0.0 }
 0x19c   : > { %1776 = vst.msk [vmem:[%s3699_s11 + $0x80] sm:$0xff] %vm1759_vm0, %v1693_v16  ;;  %v1535_v47 = vadd.f32 %v2659_v18, %v3607_v25  ;;  %v1899_v25 = vld [vmem:[%s3699_s11 + $0x18] sm:$0xff]  ;;  %v2034_v18 = vadd.f32 %v2033_v32, %v2032_v63  ;;  %v2045_v32 = vsel %vm1759_vm0, %v2006_v14, 0.0  ;;  %v1946_v63 = vsel %vm1759_vm0, %v1905_v51, 0.0 }
 0x19d   : > { %v2661_v48 = vpop.f32.mrf.mxu1  ;;  %v2773_v52 = vpop.f32.mrf.mxu0  ;;  %v2001_v19 = vmul.f32 %v1899_v25, %v1899_v25  ;;  %v1934_v37 = vsel %vm1759_vm0, %v1899_v25, 0.0 }
 0x19e   : > { %v1696_v20 = vadd.f32 %v2771_v46, %v1535_v47  ;;  %v2662_v59 = vadd.f32 %v2661_v48, %v2660_v2  ;;  %v2774_v62 = vadd.f32 %v2773_v52, %v2772_v4  ;;  %v2037_v4 = vsel %vm1759_vm0, %v2002_v10, 0.0 }
 0x19f   : > { %v2663_v31 = vpop.f32.mrf.mxu1  ;;  %v2775_v33 = vpop.f32.mrf.mxu0  ;;  %v2035_v49 = vsel %vm1759_vm0, %v2001_v19, 0.0  ;;  %v1938_v48 = vsel %vm1759_vm0, %v1901_v24, 0.0  ;;  %v2004_v52 = vmul.f32 %v1902_v34, %v1902_v34  ;;  %v2007_v19 = vmul.f32 %v1905_v51, %v1905_v51  ;;  %v1906_v24 = vld [vmem:[%s3699_s11 + $0x50] sm:$0xff] }
 0x1a0   : > { %1777 = vst.msk [vmem:[%s3699_s11 + $0x88] sm:$0xff] %vm1759_vm0, %v1696_v20  ;;  %v1540_v54 = vadd.f32 %v2662_v59, %v3613_v30  ;;  %v1932_v30 = vsel %vm1759_vm0, %v1898_v9, 0.0  ;;  %v2036_v7 = vadd.f32 %v2035_v49, %v2034_v18 }
 0x1a1   : > { %v2664_v53 = vpop.f32.mrf.mxu1  ;;  %v2776_v42 = vpop.f32.mrf.mxu0  ;;  %v1933_v41 = vadd.f32 %v1932_v30, %v1931_v13 }
 0x1a2   : > { %v1701_v3 = vadd.f32 %v2774_v62, %v1540_v54  ;;  %v2665_v5 = vadd.f32 %v2664_v53, %v2663_v31  ;;  %v2777_v23 = vadd.f32 %v2776_v42, %v2775_v33  ;;  %v1940_v54 = vsel %vm1759_vm0, %v1902_v34, 0.0 }
 0x1a3   : > { %v2666_v38 = vpop.f32.mrf.mxu1  ;;  %v2778_v56 = vpop.f32.mrf.mxu0  ;;  %v1935_v2 = vadd.f32 %v1934_v37, %v1933_v41  ;;  %v2005_v62 = vmul.f32 %v1903_v39, %v1903_v39  ;;  %v2038_v42 = vadd.f32 %v2037_v4, %v2036_v7  ;;  %v1907_v37 = vld [vmem:[%s3699_s11 + $0x58] sm:$0xff]  ;;  %v2008_v41 = vmul.f32 %v1906_v24, %v1906_v24 }
 0x1a4   : > { %1778 = vst.msk [vmem:[%s3699_s11 + $0x90] sm:$0xff] %vm1759_vm0, %v1701_v3  ;;  %v1543_v58 = vadd.f32 %v2665_v5, %v3619_v35  ;;  %v2041_v5 = vsel %vm1759_vm0, %v2004_v52, 0.0  ;;  %v2009_v18 = vmul.f32 %v1907_v37, %v1907_v37 }
 0x1a5   : > { %v2667_v15 = vpop.f32.mrf.mxu1  ;;  %v2779_v22 = vpop.f32.mrf.mxu0  ;;  %v1937_v9 = vadd.f32 %v1936_v26, %v1935_v2  ;;  %v1909_v2 = vld [vmem:[%s3699_s11 + $0x68] sm:$0xff] }
 0x1a6   : > { %v1704_v27 = vadd.f32 %v2777_v23, %v1543_v58  ;;  %v2668_v61 = vadd.f32 %v2667_v15, %v2666_v38  ;;  %v2780_v16 = vadd.f32 %v2779_v22, %v2778_v56  ;;  %v2043_v23 = vsel %vm1759_vm0, %v2005_v62, 0.0 }
 0x1a7   : > { %v2669_v35 = vpop.f32.mrf.mxu1  ;;  %v2781_v44 = vpop.f32.mrf.mxu0  ;;  %v1939_v12 = vadd.f32 %v1938_v48, %v1937_v9  ;;  %v2051_v51 = vsel %vm1759_vm0, %v2009_v18, 0.0 }
 0x1a8   : > { %1779 = vst.msk [vmem:[%s3699_s11 + $0x98] sm:$0xff] %vm1759_vm0, %v1704_v27  ;;  %v1548_v28 = vadd.f32 %v2668_v61, %v3625_v40  ;;  %v2039_v40 = vsel %vm1759_vm0, %v2003_v43, 0.0  ;;  %v1908_v43 = vld [vmem:[%s3699_s11 + $0x60] sm:$0xff] }
 0x1a9   : > { %v2670_v47 = vpop.f32.mrf.mxu1  ;;  %v2782_v46 = vpop.f32.mrf.mxu0  ;;  %v2040_v56 = vadd.f32 %v2039_v40, %v2038_v42  ;;  %v1941_v30 = vadd.f32 %v1940_v54, %v1939_v12  ;;  %v2010_v48 = vmul.f32 %v1908_v43, %v1908_v43  ;;  %v1910_v54 = vld [vmem:[%s3699_s11 + $0x70] sm:$0xff] }
 0x1aa   : > { %v1709_v20 = vadd.f32 %v2780_v16, %v1548_v28  ;;  %v2671_v59 = vadd.f32 %v2670_v47, %v2669_v35  ;;  %v2783_v53 = vadd.f32 %v2782_v46, %v2781_v44  ;;  %v1948_v16 = vsel %vm1759_vm0, %v1906_v24, 0.0 }
 0x1ab   : > { %v2672_v31 = vpop.f32.mrf.mxu1  ;;  %v2784_v33 = vpop.f32.mrf.mxu0  ;;  %v2042_v15 = vadd.f32 %v2041_v5, %v2040_v56  ;;  %v1943_v22 = vadd.f32 %v1942_v21, %v1941_v30  ;;  %v1912_v56 = vld [vmem:[%s3699_s11 + $0x80] sm:$0xff] }
 0x1ac   : > { %1780 = vst.msk [vmem:[%s3699_s11 + $0xa0] sm:$0xff] %vm1759_vm0, %v1709_v20  ;;  %v1551_v25 = vadd.f32 %v2671_v59, %v3631_v45  ;;  %v2049_v20 = vsel %vm1759_vm0, %v2008_v41, 0.0  ;;  %v1950_v59 = vsel %vm1759_vm0, %v1907_v37, 0.0  ;;  %v1960_v18 = vsel %vm1759_vm0, %v1912_v56, 0.0 }
 0x1ad   : > { %v2673_v0 = vpop.f32.mrf.mxu1  ;;  %v2785_v3 = vpop.f32.mrf.mxu0  ;;  %v2044_v44 = vadd.f32 %v2043_v23, %v2042_v15  ;;  %v1945_v49 = vadd.f32 %v1944_v8, %v1943_v22  ;;  %v1956_v8 = vsel %vm1759_vm0, %v1910_v54, 0.0 }
 0x1ae   : > { %v1712_v36 = vadd.f32 %v2783_v53, %v1551_v25  ;;  %v2674_v38 = vadd.f32 %v2673_v0, %v2672_v31  ;;  %v2786_v10 = vadd.f32 %v2785_v3, %v2784_v33  ;;  %v2011_v33 = vmul.f32 %v1909_v2, %v1909_v2  ;;  %v1911_v3 = vld [vmem:[%s3699_s11 + $0x78] sm:$0xff] }
 0x1af   : > { %v2675_v45 = vpop.f32.mrf.mxu1  ;;  %v2787_v58 = vpop.f32.mrf.mxu0  ;;  %v2046_v47 = vadd.f32 %v2045_v32, %v2044_v44  ;;  %v1947_v46 = vadd.f32 %v1946_v63, %v1945_v49  ;;  %v1952_v25 = vsel %vm1759_vm0, %v1908_v43, 0.0  ;;  %v2053_v0 = vsel %vm1759_vm0, %v2010_v48, 0.0  ;;  %v1915_v48 = vld [vmem:[%s3699_s11 + $0x98] sm:$0xff] }
 0x1b0   : > { %1781 = vst.msk [vmem:[%s3699_s11 + $0xa8] sm:$0xff] %vm1759_vm0, %v1712_v36  ;;  %v1556_v13 = vadd.f32 %v2674_v38, %v3637_v50  ;;  %v2047_v50 = vsel %vm1759_vm0, %v2007_v19, 0.0  ;;  %v1954_v36 = vsel %vm1759_vm0, %v1909_v2, 0.0  ;;  %v2012_v38 = vmul.f32 %v1910_v54, %v1910_v54 }
 0x1b1   : > { %v2676_v27 = vpop.f32.mrf.mxu1  ;;  %v2788_v61 = vpop.f32.mrf.mxu0  ;;  %v2048_v40 = vadd.f32 %v2047_v50, %v2046_v47  ;;  %v1949_v31 = vadd.f32 %v1948_v16, %v1947_v46  ;;  %v1958_v43 = vsel %vm1759_vm0, %v1911_v3, 0.0 }
 0x1b2   : > { %v1717_v34 = vadd.f32 %v2786_v10, %v1556_v13  ;;  %v2677_v35 = vadd.f32 %v2676_v27, %v2675_v45  ;;  %v2789_v39 = vadd.f32 %v2788_v61, %v2787_v58  ;;  %v2013_v13 = vmul.f32 %v1911_v3, %v1911_v3  ;;  %v1913_v10 = vld [vmem:[%s3699_s11 + $0x88] sm:$0xff] }
 0x1b3   : > { %v2678_v26 = vpop.f32.mrf.mxu1  ;;  %v2790_v28 = vpop.f32.mrf.mxu0  ;;  %v2050_v12 = vadd.f32 %v2049_v20, %v2048_v40  ;;  %v1951_v14 = vadd.f32 %v1950_v59, %v1949_v31  ;;  %v2014_v27 = vmul.f32 %v1912_v56, %v1912_v56  ;;  %v2057_v41 = vsel %vm1759_vm0, %v2012_v38, 0.0 }
 0x1b4   : > { %1782 = vst.msk [vmem:[%s3699_s11 + $0xb0] sm:$0xff] %vm1759_vm0, %v1717_v34  ;;  %v1559_v4 = vadd.f32 %v2677_v35, %v3643_v55  ;;  %v2015_v50 = vmul.f32 %v1913_v10, %v1913_v10  ;;  %v2059_v16 = vsel %vm1759_vm0, %v2013_v13, 0.0  ;;  %v1962_v20 = vsel %vm1759_vm0, %v1913_v10, 0.0 }
 0x1b5   : > { %v2679_v52 = vpop.f32.mrf.mxu1  ;;  %v2791_v57 = vpop.f32.mrf.mxu0  ;;  %v2052_v24 = vadd.f32 %v2051_v51, %v2050_v12  ;;  %v1953_v45 = vadd.f32 %v1952_v25, %v1951_v14  ;;  %v2061_v46 = vsel %vm1759_vm0, %v2014_v27, 0.0  ;;  %v2017_v51 = vmul.f32 %v1915_v48, %v1915_v48 }
 0x1b6   : > { %v1720_v7 = vadd.f32 %v2789_v39, %v1559_v4  ;;  %v2680_v9 = vadd.f32 %v2679_v52, %v2678_v26  ;;  %v2792_v42 = vadd.f32 %v2791_v57, %v2790_v28  ;;  %v1914_v26 = vld [vmem:[%s3699_s11 + $0x90] sm:$0xff] }
 0x1b7   : > { %v2681_v55 = vpop.f32.mrf.mxu1  ;;  %v2793_v62 = vpop.f32.mrf.mxu0  ;;  %v2054_v32 = vadd.f32 %v2053_v0, %v2052_v24  ;;  %v1955_v37 = vadd.f32 %v1954_v36, %v1953_v45  ;;  %v2016_v59 = vmul.f32 %v1914_v26, %v1914_v26  ;;  %v1966_v36 = vsel %vm1759_vm0, %v1915_v48, 0.0 }
 0x1b8   : > { %1783 = vst.msk [vmem:[%s3699_s11 + $0xb8] sm:$0xff] %vm1759_vm0, %v1720_v7  ;;  %v1564_v53 = vadd.f32 %v2680_v9, %v3649_v60  ;;  %v2055_v60 = vsel %vm1759_vm0, %v2011_v33, 0.0  ;;  %v1916_v7 = vld [vmem:[%s3699_s11 + $0xa0] sm:$0xff]  ;;  %v2067_v13 = vsel %vm1759_vm0, %v2017_v51, 0.0 }
 0x1b9   : > { %v2682_v5 = vpop.f32.mrf.mxu1  ;;  %v2794_v21 = vpop.f32.mrf.mxu0  ;;  %v2056_v44 = vadd.f32 %v2055_v60, %v2054_v32  ;;  %v1957_v49 = vadd.f32 %v1956_v8, %v1955_v37  ;;  %v2018_v0 = vmul.f32 %v1916_v7, %v1916_v7  ;;  %v1968_v8 = vsel %vm1759_vm0, %v1916_v7, 0.0 }
 0x1ba   : > { %v1725_v30 = vadd.f32 %v2792_v42, %v1564_v53  ;;  %v2683_v19 = vadd.f32 %v2682_v5, %v2681_v55  ;;  %v2795_v22 = vadd.f32 %v2794_v21, %v2793_v62  ;;  %v1964_v62 = vsel %vm1759_vm0, %v1914_v26, 0.0  ;;  %v1917_v42 = vld [vmem:[%s3699_s11 + $0xa8] sm:$0xff] }
 0x1bb   : > { %v2684_v58 = vpop.f32.mrf.mxu1  ;;  %v2796_v23 = vpop.f32.mrf.mxu0  ;;  %v2058_v39 = vadd.f32 %v2057_v41, %v2056_v44  ;;  %v1959_v47 = vadd.f32 %v1958_v43, %v1957_v49  ;;  %v2065_v21 = vsel %vm1759_vm0, %v2016_v59, 0.0  ;;  %v1918_v45 = vld [vmem:[%s3699_s11 + $0xb0] sm:$0xff]  ;;  %v2019_v60 = vmul.f32 %v1917_v42, %v1917_v42 }
 0x1bc   : > { %1784 = vst.msk [vmem:[%s3699_s11 + $0xc0] sm:$0xff] %vm1759_vm0, %v1725_v30  ;;  %v1567_v15 = vadd.f32 %v2683_v19, %v3655_v1  ;;  %v2069_v27 = vsel %vm1759_vm0, %v2018_v0, 0.0  ;;  %v1970_v43 = vsel %vm1759_vm0, %v1917_v42, 0.0 }
 0x1bd   : > { %v2685_v61 = vpop.f32.mrf.mxu1  ;;  %v2797_v63 = vpop.f32.mrf.mxu0  ;;  %v2060_v31 = vadd.f32 %v2059_v16, %v2058_v39  ;;  %v1961_v33 = vadd.f32 %v1960_v18, %v1959_v47  ;;  %v1972_v16 = vsel %vm1759_vm0, %v1918_v45, 0.0 }
 0x1be   : > { %v1728_v34 = vadd.f32 %v2795_v22, %v1567_v15  ;;  %v2686_v35 = vadd.f32 %v2685_v61, %v2684_v58  ;;  %v2798_v4 = vadd.f32 %v2797_v63, %v2796_v23 }
 0x1bf   : > { %v2687_v1 = vpop.f32.mrf.mxu1  ;;  %v2799_v28 = vpop.f32.mrf.mxu0  ;;  %v2062_v12 = vadd.f32 %v2061_v46, %v2060_v31  ;;  %v1963_v14 = vadd.f32 %v1962_v20, %v1961_v33  ;;  %v1919_v22 = vld [vmem:[%s3699_s11 + $0xb8] sm:$0xff]  ;;  %v4005_v33 = vld [vmem:[#allocation11_spill] sm:$0xff] }
 0x1c0   : > { %1785 = vst.msk [vmem:[%s3699_s11 + $0xc8] sm:$0xff] %vm1759_vm0, %v1728_v34  ;;  %v1572_v2 = vadd.f32 %v2686_v35, %v3661_v6  ;;  %v2063_v6 = vsel %vm1759_vm0, %v2015_v50, 0.0  ;;  %v2071_v50 = vsel %vm1759_vm0, %v2019_v60, 0.0  ;;  %v2021_v18 = vmul.f32 %v1919_v22, %v1919_v22 }
 0x1c1   : > { %v2688_v52 = vpop.f32.mrf.mxu1  ;;  %v2800_v57 = vpop.f32.mrf.mxu0  ;;  %v2064_v30 = vadd.f32 %v2063_v6, %v2062_v12  ;;  %v1965_v19 = vadd.f32 %v1964_v62, %v1963_v14 }
 0x1c2   : > { %v1733_v9 = vadd.f32 %v2798_v4, %v1572_v2  ;;  %v2689_v40 = vadd.f32 %v2688_v52, %v2687_v1  ;;  %v2801_v53 = vadd.f32 %v2800_v57, %v2799_v28  ;;  %v1974_v57 = vsel %vm1759_vm0, %v1919_v22, 0.0 }
 0x1c3   : > { %v2690_v54 = vpop.f32.mrf.mxu1  ;;  %v2802_v55 = vpop.f32.mrf.mxu0  ;;  %v1967_v32 = vadd.f32 %v1966_v36, %v1965_v19  ;;  %v2066_v37 = vadd.f32 %v2065_v21, %v2064_v30  ;;  %v1920_v41 = vld [vmem:[%s3699_s11 + $0xc0] sm:$0xff]  ;;  %v2075_v62 = vsel %vm1759_vm0, %v2021_v18, 0.0  ;;  %v4006_v19 = vld [vmem:[#allocation12_spill] sm:$0xff] }
 0x1c4   : > { %1786 = vst.msk [vmem:[%s3699_s11 + $0xd0] sm:$0xff] %vm1759_vm0, %v1733_v9  ;;  %v1575_v25 = vadd.f32 %v2689_v40, %v3667_v11  ;;  %v2022_v47 = vmul.f32 %v1920_v41, %v1920_v41 }
 0x1c5   : > { %v2691_v3 = vpop.f32.mrf.mxu1  ;;  %v2803_v5 = vpop.f32.mrf.mxu0  ;;  %v1969_v44 = vadd.f32 %v1968_v8, %v1967_v32  ;;  %v2068_v49 = vadd.f32 %v2067_v13, %v2066_v37 }
 0x1c6   : > { %v1736_v38 = vadd.f32 %v2801_v53, %v1575_v25  ;;  %v2692_v56 = vadd.f32 %v2691_v3, %v2690_v54  ;;  %v2804_v23 = vadd.f32 %v2803_v5, %v2802_v55  ;;  %v1976_v55 = vsel %vm1759_vm0, %v1920_v41, 0.0 }
 0x1c7   : > { %v2693_v24 = vpop.f32.mrf.mxu1  ;;  %v2805_v11 = vpop.f32.mrf.mxu0  ;;  %v1921_v28 = vld [vmem:[%s3699_s11 + $0xc8] sm:$0xff]  ;;  %v1971_v39 = vadd.f32 %v1970_v43, %v1969_v44  ;;  %v2070_v46 = vadd.f32 %v2069_v27, %v2068_v49  ;;  %v2077_v14 = vsel %vm1759_vm0, %v2022_v47, 0.0 }
 0x1c8   : > { %1787 = vst.msk [vmem:[%s3699_s11 + $0xd8] sm:$0xff] %vm1759_vm0, %v1736_v38  ;;  %v1580_v58 = vadd.f32 %v2692_v56, %v3673_v17  ;;  %v2020_v17 = vmul.f32 %v1918_v45, %v1918_v45  ;;  %v2023_v40 = vmul.f32 %v1921_v28, %v1921_v28  ;;  %v1978_v5 = vsel %vm1759_vm0, %v1921_v28, 0.0 }
 0x1c9   : > { %v2694_v10 = vpop.f32.mrf.mxu1  ;;  %v2806_v15 = vpop.f32.mrf.mxu0  ;;  %v1973_v9 = vadd.f32 %v1972_v16, %v1971_v39  ;;  %v2072_v31 = vadd.f32 %v2071_v50, %v2070_v46 }
 0x1ca   : > { %v1741_v61 = vadd.f32 %v2804_v23, %v1580_v58  ;;  %v2695_v63 = vadd.f32 %v2694_v10, %v2693_v24  ;;  %v2807_v1 = vadd.f32 %v2806_v15, %v2805_v11  ;;  %v2073_v20 = vsel %vm1759_vm0, %v2020_v17, 0.0 }
 0x1cb   : > { %v2696_v34 = vpop.f32.mrf.mxu1  ;;  %v2808_v35 = vpop.f32.mrf.mxu0  ;;  %v1922_v7 = vld [vmem:[%s3699_s11 + $0xd0] sm:$0xff]  ;;  %v1975_v42 = vadd.f32 %v1974_v57, %v1973_v9  ;;  %v2074_v12 = vadd.f32 %v2073_v20, %v2072_v31  ;;  %v2079_v30 = vsel %vm1759_vm0, %v2023_v40, 0.0 }
 0x1cc   : > { %1788 = vst.msk [vmem:[%s3699_s11 + $0xe0] sm:$0xff] %vm1759_vm0, %v1741_v61  ;;  %v1583_v26 = vadd.f32 %v2695_v63, %v3679_v29  ;;  %v2024_v21 = vmul.f32 %v1922_v7, %v1922_v7  ;;  %v1980_v45 = vsel %vm1759_vm0, %v1922_v7, 0.0 }
 0x1cd   : > { %v2697_v2 = vpop.f32.mrf.mxu1  ;;  %v2809_v4 = vpop.f32.mrf.mxu0  ;;  %v1977_v38 = vadd.f32 %v1976_v55, %v1975_v42  ;;  %v2076_v56 = vadd.f32 %v2075_v62, %v2074_v12 }
 0x1ce   : > { %v1744_v48 = vadd.f32 %v2807_v1, %v1583_v26  ;;  %v2698_v52 = vadd.f32 %v2697_v2, %v2696_v34  ;;  %v2810_v54 = vadd.f32 %v2809_v4, %v2808_v35  ;;  %v2081_v15 = vsel %vm1759_vm0, %v2024_v21, 0.0 }
 0x1cf   : > { %v2699_v29 = vpop.f32.mrf.mxu1  ;;  %v2811_v59 = vpop.f32.mrf.mxu0  ;;  %v1923_v53 = vld [vmem:[%s3699_s11 + $0xd8] sm:$0xff]  ;;  %v1979_v58 = vadd.f32 %v1978_v5, %v1977_v38  ;;  %v2078_v23 = vadd.f32 %v2077_v14, %v2076_v56 }
 0x1d0   : > { %1789 = vst.msk [vmem:[%s3699_s11 + $0xe8] sm:$0xff] %vm1759_vm0, %v1744_v48  ;;  %v1588_v6 = vadd.f32 %v2698_v52, %v4005_v33  ;;  %v2025_v60 = vmul.f32 %v1923_v53, %v1923_v53  ;;  %v1982_v13 = vsel %vm1759_vm0, %v1923_v53, 0.0 }
 0x1d1   : > { %v2700_v51 = vpop.f32.mrf.mxu1  ;;  %v2812_v25 = vpop.f32.mrf.mxu0  ;;  %v1981_v32 = vadd.f32 %v1980_v45, %v1979_v58  ;;  %v2080_v37 = vadd.f32 %v2079_v30, %v2078_v23 }
 0x1d2   : > { %v1749_v0 = vadd.f32 %v2810_v54, %v1588_v6  ;;  %v2701_v3 = vadd.f32 %v2700_v51, %v2699_v29  ;;  %v2813_v11 = vadd.f32 %v2812_v25, %v2811_v59  ;;  %v2083_v63 = vsel %vm1759_vm0, %v2025_v60, 0.0 }
 0x1d3   : > { %v1924_v36 = vld [vmem:[%s3699_s11 + $0xe0] sm:$0xff]  ;;  %v1983_v41 = vadd.f32 %v1982_v13, %v1981_v32  ;;  %v2082_v43 = vadd.f32 %v2081_v15, %v2080_v37 }
 0x1d4   : > { %1790 = vst.msk [vmem:[%s3699_s11 + $0xf0] sm:$0xff] %vm1759_vm0, %v1749_v0  ;;  %v1591_v24 = vadd.f32 %v2701_v3, %v4006_v19  ;;  %v2026_v10 = vmul.f32 %v1924_v36, %v1924_v36  ;;  %v1984_v27 = vsel %vm1759_vm0, %v1924_v36, 0.0 }
 0x1d5   : > { %v1985_v44 = vadd.f32 %v1984_v27, %v1983_v41  ;;  %v2084_v49 = vadd.f32 %v2083_v63, %v2082_v43 }
 0x1d6   : > { %v1752_v8 = vadd.f32 %v2813_v11, %v1591_v24  ;;  %v2085_v34 = vsel %vm1759_vm0, %v2026_v10, 0.0 }
 0x1d7   : > { %v1925_v22 = vld [vmem:[%s3699_s11 + $0xe8] sm:$0xff]  ;;  %v2086_v16 = vadd.f32 %v2085_v34, %v2084_v49 }
 0x1d8   : > { %1791 = vst.msk [vmem:[%s3699_s11 + $0xf8] sm:$0xff] %vm1759_vm0, %v1752_v8  ;;  %v2027_v61 = vmul.f32 %v1925_v22, %v1925_v22  ;;  %v1986_v17 = vsel %vm1759_vm0, %v1925_v22, 0.0 }
 0x1d9   : > { %v1987_v28 = vadd.f32 %v1986_v17, %v1985_v44 }
 0x1da   : > { %v2087_v1 = vsel %vm1759_vm0, %v2027_v61, 0.0 }
 0x1db   : > { %v1926_v35 = vld [vmem:[%s3699_s11 + $0xf0] sm:$0xff]  ;;  %v2088_v39 = vadd.f32 %v2087_v1, %v2086_v16 }
 0x1dc   : > { %v1988_v50 = vsel %vm1759_vm0, %v1926_v35, 0.0  ;;  %v2028_v26 = vmul.f32 %v1926_v35, %v1926_v35 }
 0x1dd   : > { %v1989_v4 = vadd.f32 %v1988_v50, %v1987_v28 }
 0x1de   : > { %v2089_v18 = vsel %vm1759_vm0, %v2028_v26, 0.0 }
 0x1df   : > { %v1927_v2 = vld [vmem:[%s3699_s11 + $0xf8] sm:$0xff]  ;;  %v2090_v52 = vadd.f32 %v2089_v18, %v2088_v39  ;;  %s3126_s11 = sshll.u32 %s3237_s8, 4  ;;  %s3127_s11 = int_to_ptr.vmem [resolvable:$false] %s3126_s11 }
 0x1e0   : > { %v1990_v47 = vsel %vm1759_vm0, %v1927_v2, 0.0  ;;  %v2029_v46 = vmul.f32 %v1927_v2, %v1927_v2  ;;  %s3128_s12 = scalar_lea.vmem %s3127_s11, 256  ;;  %p3129_p3 = scmp.lt.s32.totalorder %s3917_s21, %s3127_s11 }
 0x1e1   : > { %v1991_v48 = vadd.f32 %v1990_v47, %v1989_v4  ;;  %p3130_p5 = scmp.lt.s32.totalorder %s3128_s12, %s3122_s9 }
 0x1e2   : > { %v2091_v57 = vsel %vm1759_vm0, %v2029_v46, 0.0 }
 0x1e3   : > { %v1992_v20 = vrot.slane %v1991_v48, 4  ;;  %v2092_v29 = vadd.f32 %v2091_v57, %v2090_v52  ;;  %p3131_p4 = por %p3130_p5, %p3129_p3 }
 0x1e5   : > { %v1993_v59 = vadd.f32 %v1992_v20, %v1991_v48  ;;  %v2093_v7 = vrot.slane %v2092_v29, 4  ;;  %p3132_p6 = pnand %p3131_p4, %p3125_p2 }
 0x1e7   : > { %v1994_v9 = vrot.slane %v1993_v59, 2  ;;  %v2094_v40 = vadd.f32 %v2093_v7, %v2092_v29 }
 0x1e9   : > { %v1995_v31 = vadd.f32 %v1994_v9, %v1993_v59  ;;  %v2095_v33 = vrot.slane %v2094_v40, 2 }
 0x1eb   : > { %v1996_v6 = vrot.slane %v1995_v31, 1  ;;  %v2096_v54 = vadd.f32 %v2095_v33, %v2094_v40 }
 0x1ed   : > { %v1997_v55 = vadd.f32 %v1996_v6, %v1995_v31  ;;  %v2097_v62 = vrot.slane %v2096_v54, 1 }
 0x1ef   : > { %2099 = vst.msk [vmem:[%s283_s14] sm:$0xff] %vm1759_vm0, %v1997_v55  ;;  %v2098_v51 = vadd.f32 %v2097_v62, %v2096_v54 }
 0x1f0   : > { %3135 = shalt.err (!%p3132_p6)
}
 0x1f1   : > { %s3136_s13 = scalar_lea.hbm %s3915_s26, 128  ;;  %s3140_s25 = scalar_lea.hbm %s3996_s3, 512 }
 0x1f2   : > { %p3137_p7 = scmp.ne.s32.totalorder %s3915_s26, %s3136_s13  ;;  %p3141_p1 = scmp.lt.s32.totalorder %s3915_s26, %s3996_s3 }
 0x1f3   : > { %p3142_p8 = scmp.lt.s32.totalorder %s3140_s25, %s3136_s13 }
 0x1f4   : > { %p3138_p10 = pnand %p3137_p7, %p3315_p9 }
 0x1f5   : > { %p3143_p13 = por %p3142_p8, %p3141_p1 }
 0x1f6   : > { %p3139_p12 = pneg %p3138_p10 }
 0x1f8   : > { %p3144_p0 = pnand %p3143_p13, %p3139_p12 }
 0x1fa   : > { %3147 = shalt.err (!%p3144_p0)
}
 0x1fb   : > { %2835 = dma.vmem_to_hbm [thread:$0]  (%p3315_p9), %s3917_s21, 128, %s3915_s26, %s2110_s7   ;;  %2100 = vst.msk [vmem:[%s3909_s22] sm:$0xff] %vm1759_vm0, %v2098_v51 }
 0x1fc   : > { %s2115_s9 = scalar_lea.sflag [#allocation7], %s3347_s6  ;;  %s3148_s8 = scalar_lea.vmem %s3925_s24, 128 }
 0x1fd   : > { %p3149_p2 = scmp.ne.s32.totalorder %s3925_s24, %s3148_s8  ;;  %s3238_s11 = smov [#allocation6]  }
 0x1fe   : > { %s3152_s12 = sshll.u32 %s3238_s11, 4  ;;  %s3153_s12 = int_to_ptr.vmem [resolvable:$false] %s3152_s12 }
 0x1ff   : > { %p3150_p3 = pnand %p3149_p2, %p3315_p9  ;;  %s3154_s13 = scalar_lea.vmem %s3153_s12, 256 }
 0x200   : > { %p3155_p4 = scmp.lt.s32.totalorder %s3925_s24, %s3153_s12  ;;  %p3156_p6 = scmp.lt.s32.totalorder %s3154_s13, %s3148_s8 }
 0x201   : > { %p3151_p5 = pneg %p3150_p3 }
 0x202   : > { %p3157_p7 = por %p3156_p6, %p3155_p4 }
 0x204   : > { %p3158_p10 = pnand %p3157_p7, %p3151_p5 }
 0x206   : > { %3161 = shalt.err (!%p3158_p10)
}
 0x207   : > { %s3162_s21 = scalar_lea.hbm %s3923_s10, 128  ;;  %s3166_s26 = scalar_lea.hbm %s3997_s4, 512 }
 0x208   : > { %p3163_p12 = scmp.ne.s32.totalorder %s3923_s10, %s3162_s21  ;;  %p3167_p13 = scmp.lt.s32.totalorder %s3923_s10, %s3997_s4 }
 0x209   : > { %p3168_p0 = scmp.lt.s32.totalorder %s3166_s26, %s3162_s21 }
 0x20a   : > { %p3164_p1 = pnand %p3163_p12, %p3315_p9 }
 0x20b   : > { %p3169_p2 = por %p3168_p0, %p3167_p13 }
 0x20c   : > { %p3165_p8 = pneg %p3164_p1 }
 0x20e   : > { %p3170_p3 = pnand %p3169_p2, %p3165_p8 }
 0x210   : > { %3173 = shalt.err (!%p3170_p3)
}
 0x211   : > { %2836 = dma.vmem_to_hbm [thread:$0]  (%p3315_p9), %s3925_s24, 128, %s3923_s10, %s2115_s9  }
 0x212 PF: > { %p2851_p5 = scmp.ge.s32.totalorder %s3232_s20, 2  ;;  %s2170_s27 = sand.u32 1, %s3212_s15  }
 0x213   : > { %s2171_s25 = scalar_lea.sflag [#allocation4], %s2170_s27 }
 0x214   : > { %p2844_p4 = pnand %p2851_p5, %p3322_p11 }
 0x216   : > { %p2845_p6 = pneg %p2844_p4 }
 0x218   : > { %3203 = dma.done.wait (%p2845_p6), %s2171_s25, 128  }
 0x219   : > { %3205 = vsyncadd (%p2845_p6), %s2171_s25, 4294967168  ;;  %s2180_s18 = scalar_lea.sflag [#allocation7], %s2170_s27 }
 0x21a   : > { %3207 = dma.done.wait (%p2845_p6), %s2180_s18, 128  }
 0x21b   : > { %3209 = vsyncadd (%p2845_p6), %s2180_s18, 4294967168  ;;  %s24_s20 = sadd.s32 1, %s3232_s20   ;;  %s4007_s15 = smov %s3216_s16 }
 0x21c   : > { %p21_p7 = scmp.ge.s32.totalorder %s24_s20, 6   ;;  %s4008_s16 = smov %s3220_s17 }
 0x21d   : > { %s4009_s17 = smov %s3320_s29  ;;  %s4010_s18 = smov %s3228_s19 }
 0x21e   : > { %s4011_s19 = smov %s4013_s23  ;;  %23 = sbr.rel (!%p21_p7) target bundleno = 8 (0x8), region = 117 }
 0x223   :  { %2185 = vsyncpa [#allocation3], 1 }
 0x224   :  { %2187 = vsyncpa [#allocation3 + $0x1], 1 }
 0x225   :  { %2188 = vsyncpa [#allocation4], 1 }
 0x226   :  { %2190 = vsyncpa [#allocation4 + $0x1], 1 }
 0x227   :  { %2191 = vsyncpa [#allocation7], 1 }
 0x228   :  { %2193 = vsyncpa [#allocation7 + $0x1], 1 }

</bundles_post_ra>
